<compile_context>
chip_gen: v7x
topology: tpu7x:2x2x1
jax: 0.10.0
libtpu: 0.0.40
codegen_flags: <defaults>
</compile_context>

<pallas_src>
import functools

import jax
import jax.numpy as jnp
from jax import lax
from jax.experimental import pallas as pl
from jax.experimental.pallas import tpu as pltpu

EPS = 1e-5                      # PyTorch BatchNorm2d default eps
_LANE = 128


def _detect_budget():
    """Per-generation VMEM limit + row-tile target (v5e/v6e have 128 MiB VMEM)."""
    try:
        info = pltpu.get_tpu_info()
        cap = getattr(info, "vmem_capacity_bytes", None)
        if cap is not None and cap >= 96 * 1024 * 1024:
            return 96 * 1024 * 1024, 4096          # v5e / v6e: big tiles
    except Exception:
        pass
    return 48 * 1024 * 1024, 2048                  # v7x (64 MiB/TC) or unknown


_VMEM_LIMIT, _DEFAULT_TARGET_ROWS = _detect_budget()


def _round_up(x, m):
    return (x + m - 1) // m * m


def _pick_tile(total, row_unit, target_rows, align8):
    """Largest divisor t of `total` with t*row_unit <= target_rows.

    If align8, additionally require (t*row_unit) % 8 == 0 (second-minor block
    alignment) unless t == total.  Prefers >= 2 grid steps (v7x megacore) when
    the block still has >= 512 rows.
    """
    # TODO(synk): pad `total` / mask the tail tile so awkward (prime) sizes do
    # not collapse to tiny blocks; divisor-only tiling is exact for now.
    divs = set()
    i = 1
    while i * i <= total:
        if total % i == 0:
            divs.add(i)
            divs.add(total // i)
        i += 1
    legal = [t for t in sorted(divs)
             if (not align8) or (t * row_unit) % 8 == 0 or t == total]
    fit = [t for t in legal if t * row_unit <= target_rows]
    if not fit:
        return min(legal)
    multi = [t for t in fit if total // t >= 2 and t * row_unit >= 512]
    return max(multi) if multi else max(fit)


@functools.partial(jax.jit, static_argnames=("stride", "target_rows"))
def depthwise_separable_conv(x_nchw, dw_weight, pw_weight,
                             gamma_dw, beta_dw, gamma_pw, beta_pw,
                             stride, target_rows=None):
    """x_nchw: (N, Cin, H, W); dw_weight: (Cin,1,3,3); pw_weight: (Cout,Cin,1,1)."""
    if target_rows is None:
        target_rows = _DEFAULT_TARGET_ROWS
    N, Cin, H, W = x_nchw.shape
    Cout = pw_weight.shape[0]
    Ho = (H + 2 - 3) // stride + 1
    Wo = (W + 2 - 3) // stride + 1
    R = N * Ho                       # flattened (batch, output row) units
    P = R * Wo                       # total output pixels
    Cp = _round_up(Cin, _LANE)       # lane-padded input channels
    Cop = _round_up(Cout, _LANE)     # lane-padded output channels
    Wp = Wo + 2                      # per-phase padded width
    n_tap = 3 * stride

    f32, bf16 = jnp.float32, jnp.bfloat16

    # ---- glue: NCHW -> NHWC, zero-pad spatial + channels, and build the
    #      3*stride H-strided / W-phase views (avoids a 9x im2col in HBM). ----
    # TODO(synk): replace the staged `taps` array with an overlapping-halo
    # manual DMA of the padded input (memory_space=pl.ANY) for exactly 1x
    # input HBM traffic, most valuable at stride=1 / small Cin.
    x = jnp.transpose(x_nchw, (0, 2, 3, 1)).astype(f32)
    xp = jnp.pad(x, ((0, 0), (1, 1), (1, 1), (0, Cp - Cin)))
    taps = []
    for ki in range(3):
        rows = lax.slice(xp, (0, ki, 0, 0),
                         (N, ki + stride * (Ho - 1) + 1, W + 2, Cp),
                         (1, stride, 1, 1))                  # (N, Ho, W+2, Cp)
        for r in range(stride):
            ph = rows[:, :, r::stride, :]                    # W phase r
            ph = jnp.pad(ph, ((0, 0), (0, 0), (0, Wp - ph.shape[2]), (0, 0)))
            taps.append(ph.reshape(R, Wp, Cp))
    taps = jnp.stack(taps, axis=0).astype(bf16)              # (3*stride,R,Wp,Cp)

    # ---- parameter reshapes (glue) ------------------------------------------
    dww = jnp.transpose(dw_weight.reshape(Cin, 9), (1, 0)).astype(f32)
    dww = jnp.pad(dww, ((0, 16 - 9), (0, Cp - Cin)))                   # (16,Cp)
    pww = jnp.transpose(pw_weight.reshape(Cout, Cin), (1, 0))
    pww = jnp.pad(pww, ((0, Cp - Cin), (0, Cop - Cout))).astype(bf16)  # (Cp,Cop)
    g1 = jnp.pad(gamma_dw.astype(f32), (0, Cp - Cin), constant_values=1.0)
    b1 = jnp.pad(beta_dw.astype(f32), (0, Cp - Cin))
    g2 = jnp.pad(gamma_pw.astype(f32), (0, Cop - Cout), constant_values=1.0)
    b2 = jnp.pad(beta_pw.astype(f32), (0, Cop - Cout))

    # ========= pass 1: depthwise 3x3 (bf16 out) + BN1 partial stats ==========
    TR = _pick_tile(R, Wo, target_rows, align8=False)
    G1 = R // TR
    # TODO(synk): when Wo % 8 != 0 (MobileNet tails 7/14/28), pad the
    # second-minor dim of the intermediate to a multiple of 8 (with a masked
    # pass-2 view) to keep unmasked vst and a free in-kernel reshape.

    def dw_kernel(taps_ref, w_ref, dw_ref, st_ref):
        w_all = w_ref[...]                                    # (16, Cp) f32
        # Group taps by intra-phase shift q: only one value-level misaligned
        # slice per q (<= 2) instead of one per tap (up to 6 at stride=1).
        acc_q = {}
        for k in range(9):                                    # static unroll
            ki, kj = divmod(k, 3)
            q, r = divmod(kj, stride)
            tap = taps_ref[ki * stride + r].astype(f32)       # (TR, Wp, Cp)
            term = tap * w_all[k, :].reshape(1, 1, Cp)
            acc_q[q] = term if q not in acc_q else acc_q[q] + term
        acc = None
        for q, a in acc_q.items():
            part = a[:, q:q + Wo, :]                          # (TR, Wo, Cp)
            acc = part if acc is None else acc + part
        dw_ref[...] = acc.astype(dw_ref.dtype)                # bf16 store
        # BN1 partial stats on the otherwise-idle MXU (ones-row matmuls),
        # accumulated in f32 from the unrounded accumulator.
        acc2d = acc.reshape(TR * Wo, Cp)
        ones = jnp.ones((1, TR * Wo), f32)
        st_ref[0, 0:1, :] = jnp.dot(ones, acc2d, preferred_element_type=f32)
        st_ref[0, 1:2, :] = jnp.dot(ones, acc2d * acc2d,
                                    preferred_element_type=f32)

    bytes1 = (taps.size * taps.dtype.itemsize + 16 * Cp * 4
              + P * Cp * 2 + G1 * 2 * Cp * 4)
    flops1 = 18 * R * Wp * Cp + 6 * P * Cp
    dw_out, st1 = pl.pallas_call(
        dw_kernel,
        out_shape=(jax.ShapeDtypeStruct((R, Wo, Cp), bf16),
                   jax.ShapeDtypeStruct((G1, 2, Cp), f32)),
        grid=(G1,),
        in_specs=[pl.BlockSpec((n_tap, TR, Wp, Cp), lambda i: (0, i, 0, 0)),
                  pl.BlockSpec((16, Cp), lambda i: (0, 0))],
        out_specs=(pl.BlockSpec((TR, Wo, Cp), lambda i: (i, 0, 0)),
                   pl.BlockSpec((1, 2, Cp), lambda i: (i, 0, 0))),
        compiler_params=pltpu.CompilerParams(
            dimension_semantics=("parallel",),
            vmem_limit_bytes=_VMEM_LIMIT),
        cost_estimate=pl.CostEstimate(flops=flops1, transcendentals=0,
                                      bytes_accessed=bytes1),
    )(taps, dww)
    dw_flat = dw_out.reshape(P, Cp)                           # bf16 (P, Cp)

    # ---- glue: fold per-tile partials into BN scale/shift --------------------
    def fold(st, gamma, beta, count):
        ssum = jnp.sum(st[:, 0, :], axis=0)
        ssq = jnp.sum(st[:, 1, :], axis=0)
        mean = ssum / count
        var = jnp.maximum(ssq / count - mean * mean, 0.0)     # biased variance
        scale = gamma * lax.rsqrt(var + EPS)
        shift = beta - mean * scale
        return scale, shift

    s1, sh1 = fold(st1, g1, b1, float(P))
    aff1 = jnp.pad(jnp.stack([s1, sh1], axis=0), ((0, 6), (0, 0)))     # (8, Cp)

    # ===== pass 2: BN1 + ReLU + pointwise 1x1 (bf16 MXU) + BN2 partial stats ==
    TP = _pick_tile(P, 1, target_rows, align8=True)
    G2 = P // TP

    def pw_kernel(dw_ref, aff_ref, w_ref, y_ref, st_ref):
        h = jnp.maximum(dw_ref[...].astype(f32) * aff_ref[0:1, :]
                        + aff_ref[1:2, :], 0.0)
        # bf16 x bf16 operands on the MXU, f32 accumulation.
        y = jnp.dot(h.astype(bf16), w_ref[...], preferred_element_type=f32)
        y_ref[...] = y
        # BN2 partial stats via VPU/XLU reductions (MXU is the binding unit).
        st_ref[0, 0:1, :] = jnp.sum(y, axis=0, keepdims=True)
        st_ref[0, 1:2, :] = jnp.sum(y * y, axis=0, keepdims=True)

    bytes2 = (P * Cp * 2 + Cp * Cop * 2 + 8 * Cp * 4
              + P * Cop * 4 + G2 * 2 * Cop * 4)
    flops2 = 2 * P * Cp * Cop + 6 * P * Cp + 4 * P * Cop
    y_out, st2 = pl.pallas_call(
        pw_kernel,
        out_shape=(jax.ShapeDtypeStruct((P, Cop), f32),
                   jax.ShapeDtypeStruct((G2, 2, Cop), f32)),
        grid=(G2,),
        # NOTE: the weight / affine operands are grid-invariant; a
        # pipeline_mode=pl.Buffered(1) spec would free their second buffer.
        in_specs=[pl.BlockSpec((TP, Cp), lambda i: (i, 0)),
                  pl.BlockSpec((8, Cp), lambda i: (0, 0)),
                  pl.BlockSpec((Cp, Cop), lambda i: (0, 0))],
        out_specs=(pl.BlockSpec((TP, Cop), lambda i: (i, 0)),
                   pl.BlockSpec((1, 2, Cop), lambda i: (i, 0, 0))),
        compiler_params=pltpu.CompilerParams(
            dimension_semantics=("parallel",),
            vmem_limit_bytes=_VMEM_LIMIT),
        cost_estimate=pl.CostEstimate(flops=flops2, transcendentals=0,
                                      bytes_accessed=bytes2),
    )(dw_flat, aff1, pww)

    # ===== epilogue (XLA-fused): BN2 affine + ReLU + Cout slice + NCHW ========
    s2, sh2 = fold(st2, g2, b2, float(P))
    out = jnp.maximum(y_out[:, :Cout] * s2[:Cout][None, :]
                      + sh2[:Cout][None, :], 0.0)
    out = out.reshape(N, Ho, Wo, Cout)
    return jnp.transpose(out, (0, 3, 1, 2))                   # back to NCHW


def _ref_forward(x, dw_weight, pw_weight, gamma_dw, beta_dw, gamma_pw, beta_pw,
                 stride):
    """Pure-JAX f32 reference mirroring the PyTorch forward (training-mode BN)."""
    Cin = x.shape[1]

    def bn(z, g, b):
        m = jnp.mean(z, axis=(0, 2, 3), keepdims=True)
        v = jnp.mean((z - m) ** 2, axis=(0, 2, 3), keepdims=True)
        return ((z - m) * lax.rsqrt(v + EPS) * g.reshape(1, -1, 1, 1)
                + b.reshape(1, -1, 1, 1))

    y = lax.conv_general_dilated(x, dw_weight, (stride, stride),
                                 ((1, 1), (1, 1)), feature_group_count=Cin,
                                 dimension_numbers=("NCHW", "OIHW", "NCHW"))
    y = jnp.maximum(bn(y, gamma_dw, beta_dw), 0.0)
    y = lax.conv_general_dilated(y, pw_weight, (1, 1), "VALID",
                                 dimension_numbers=("NCHW", "OIHW", "NCHW"))
    y = jnp.maximum(bn(y, gamma_pw, beta_pw), 0.0)
    return y


if __name__ == "__main__":
    key = jax.random.PRNGKey(0)
    k1, k2, k3 = jax.random.split(key, 3)

    N, Cin, H, W = 2, 4, 16, 16
    Cout = 8

    x = jax.random.normal(k1, (N, Cin, H, W), jnp.float32)
    dw_w = jax.random.uniform(k2, (Cin, 1, 3, 3), jnp.float32, -1.0, 1.0) / 3.0
    pw_w = (jax.random.uniform(k3, (Cout, Cin, 1, 1), jnp.float32, -1.0, 1.0)
            / jnp.sqrt(float(Cin)))

    # The kernel stages activations / pointwise weights as bf16 in HBM; feed
    # bf16-representable values so the f32 reference sees identical inputs.
    x = x.astype(jnp.bfloat16).astype(jnp.float32)
    pw_w = pw_w.astype(jnp.bfloat16).astype(jnp.float32)

    g1 = jnp.ones((Cin,), jnp.float32)
    b1 = jnp.zeros((Cin,), jnp.float32)
    g2 = jnp.ones((Cout,), jnp.float32)
    b2 = jnp.zeros((Cout,), jnp.float32)

    # (stride, row-tile target): big tiles, small tiles to exercise multi-step
    # grids + globalized BN, and the stride=1 path.
    for stride, tgt in ((2, 2048), (2, 32), (1, 64)):
        out = depthwise_separable_conv(x, dw_w, pw_w, g1, b1, g2, b2,
                                       stride=stride, target_rows=tgt)
        out = jax.block_until_ready(out)
        ref = _ref_forward(x, dw_w, pw_w, g1, b1, g2, b2, stride)
        assert out.shape == ref.shape, (out.shape, ref.shape)
        err = float(jnp.max(jnp.abs(out - ref)))
        # bf16 depthwise intermediate + bf16 MXU operands => relaxed tolerance
        # vs. the pure-f32 reference (typical max-abs error ~1e-2..3e-2 here).
        assert err < 8e-2, (stride, tgt, err)

    print("KERNEL_OK")
</pallas_src>

<mosaic_0001>
module attributes {stable_mosaic.version = 11 : i64} {
  func.func @dw_kernel(%arg0: i32, %arg1: memref<6x16x10x128xbf16, #tpu.memory_space<vmem>>, %arg2: memref<16x128xf32, #tpu.memory_space<vmem>>, %arg3: memref<16x8x128xbf16, #tpu.memory_space<vmem>>, %arg4: memref<1x2x128xf32, #tpu.memory_space<vmem>>) attributes {dimension_semantics = [#tpu.dimension_semantics<parallel>], iteration_bounds = array<i64: 1>, scalar_prefetch = 0 : i64, scratch_operands = 0 : i64, tpu.core_type = #tpu.core_type<tc>, window_params = [{transform_indices = @transform_0, window_bounds = array<i64: 6, 16, 10, 128>}, {pipeline_mode = #tpu.pipeline_mode<synchronous>, transform_indices = @transform_1, window_bounds = array<i64: 16, 128>}, {transform_indices = @transform_2, window_bounds = array<i64: 16, 8, 128>}, {transform_indices = @transform_3, window_bounds = array<i64: 1, 2, 128>}]} {
    %c0 = arith.constant 0 : index
    %c0_0 = arith.constant 0 : index
    %0 = vector.load %arg2[%c0, %c0_0] : memref<16x128xf32, #tpu.memory_space<vmem>>, vector<16x128xf32>
    %c0_1 = arith.constant 0 : index
    %c0_2 = arith.constant 0 : index
    %c0_3 = arith.constant 0 : index
    %c0_4 = arith.constant 0 : index
    %1 = vector.load %arg1[%c0_1, %c0_2, %c0_3, %c0_4] : memref<6x16x10x128xbf16, #tpu.memory_space<vmem>>, vector<1x16x10x128xbf16>
    %2 = vector.shape_cast %1 : vector<1x16x10x128xbf16> to vector<16x10x128xbf16>
    %3 = arith.extf %2 : vector<16x10x128xbf16> to vector<16x10x128xf32>
    %4 = vector.extract_strided_slice %0 {offsets = [0, 0], sizes = [1, 128], strides = [1, 1]} : vector<16x128xf32> to vector<1x128xf32>
    %5 = vector.shape_cast %4 : vector<1x128xf32> to vector<128xf32>
    %6 = vector.shape_cast %5 : vector<128xf32> to vector<1x1x128xf32>
    %7 = vector.broadcast %6 : vector<1x1x128xf32> to vector<16x10x128xf32>
    %8 = arith.mulf %3, %7 : vector<16x10x128xf32>
    %c1 = arith.constant 1 : index
    %c0_5 = arith.constant 0 : index
    %c0_6 = arith.constant 0 : index
    %c0_7 = arith.constant 0 : index
    %9 = vector.load %arg1[%c1, %c0_5, %c0_6, %c0_7] : memref<6x16x10x128xbf16, #tpu.memory_space<vmem>>, vector<1x16x10x128xbf16>
    %10 = vector.shape_cast %9 : vector<1x16x10x128xbf16> to vector<16x10x128xbf16>
    %11 = arith.extf %10 : vector<16x10x128xbf16> to vector<16x10x128xf32>
    %12 = vector.extract_strided_slice %0 {offsets = [1, 0], sizes = [1, 128], strides = [1, 1]} : vector<16x128xf32> to vector<1x128xf32>
    %13 = vector.shape_cast %12 : vector<1x128xf32> to vector<128xf32>
    %14 = vector.shape_cast %13 : vector<128xf32> to vector<1x1x128xf32>
    %15 = vector.broadcast %14 : vector<1x1x128xf32> to vector<16x10x128xf32>
    %16 = arith.mulf %11, %15 : vector<16x10x128xf32>
    %17 = arith.addf %8, %16 : vector<16x10x128xf32>
    %c0_8 = arith.constant 0 : index
    %c0_9 = arith.constant 0 : index
    %c0_10 = arith.constant 0 : index
    %c0_11 = arith.constant 0 : index
    %18 = vector.load %arg1[%c0_8, %c0_9, %c0_10, %c0_11] : memref<6x16x10x128xbf16, #tpu.memory_space<vmem>>, vector<1x16x10x128xbf16>
    %19 = vector.shape_cast %18 : vector<1x16x10x128xbf16> to vector<16x10x128xbf16>
    %20 = arith.extf %19 : vector<16x10x128xbf16> to vector<16x10x128xf32>
    %21 = vector.extract_strided_slice %0 {offsets = [2, 0], sizes = [1, 128], strides = [1, 1]} : vector<16x128xf32> to vector<1x128xf32>
    %22 = vector.shape_cast %21 : vector<1x128xf32> to vector<128xf32>
    %23 = vector.shape_cast %22 : vector<128xf32> to vector<1x1x128xf32>
    %24 = vector.broadcast %23 : vector<1x1x128xf32> to vector<16x10x128xf32>
    %25 = arith.mulf %20, %24 : vector<16x10x128xf32>
    %c2 = arith.constant 2 : index
    %c0_12 = arith.constant 0 : index
    %c0_13 = arith.constant 0 : index
    %c0_14 = arith.constant 0 : index
    %26 = vector.load %arg1[%c2, %c0_12, %c0_13, %c0_14] : memref<6x16x10x128xbf16, #tpu.memory_space<vmem>>, vector<1x16x10x128xbf16>
    %27 = vector.shape_cast %26 : vector<1x16x10x128xbf16> to vector<16x10x128xbf16>
    %28 = arith.extf %27 : vector<16x10x128xbf16> to vector<16x10x128xf32>
    %29 = vector.extract_strided_slice %0 {offsets = [3, 0], sizes = [1, 128], strides = [1, 1]} : vector<16x128xf32> to vector<1x128xf32>
    %30 = vector.shape_cast %29 : vector<1x128xf32> to vector<128xf32>
    %31 = vector.shape_cast %30 : vector<128xf32> to vector<1x1x128xf32>
    %32 = vector.broadcast %31 : vector<1x1x128xf32> to vector<16x10x128xf32>
    %33 = arith.mulf %28, %32 : vector<16x10x128xf32>
    %34 = arith.addf %17, %33 : vector<16x10x128xf32>
    %c3 = arith.constant 3 : index
    %c0_15 = arith.constant 0 : index
    %c0_16 = arith.constant 0 : index
    %c0_17 = arith.constant 0 : index
    %35 = vector.load %arg1[%c3, %c0_15, %c0_16, %c0_17] : memref<6x16x10x128xbf16, #tpu.memory_space<vmem>>, vector<1x16x10x128xbf16>
    %36 = vector.shape_cast %35 : vector<1x16x10x128xbf16> to vector<16x10x128xbf16>
    %37 = arith.extf %36 : vector<16x10x128xbf16> to vector<16x10x128xf32>
    %38 = vector.extract_strided_slice %0 {offsets = [4, 0], sizes = [1, 128], strides = [1, 1]} : vector<16x128xf32> to vector<1x128xf32>
    %39 = vector.shape_cast %38 : vector<1x128xf32> to vector<128xf32>
    %40 = vector.shape_cast %39 : vector<128xf32> to vector<1x1x128xf32>
    %41 = vector.broadcast %40 : vector<1x1x128xf32> to vector<16x10x128xf32>
    %42 = arith.mulf %37, %41 : vector<16x10x128xf32>
    %43 = arith.addf %34, %42 : vector<16x10x128xf32>
    %c2_18 = arith.constant 2 : index
    %c0_19 = arith.constant 0 : index
    %c0_20 = arith.constant 0 : index
    %c0_21 = arith.constant 0 : index
    %44 = vector.load %arg1[%c2_18, %c0_19, %c0_20, %c0_21] : memref<6x16x10x128xbf16, #tpu.memory_space<vmem>>, vector<1x16x10x128xbf16>
    %45 = vector.shape_cast %44 : vector<1x16x10x128xbf16> to vector<16x10x128xbf16>
    %46 = arith.extf %45 : vector<16x10x128xbf16> to vector<16x10x128xf32>
    %47 = vector.extract_strided_slice %0 {offsets = [5, 0], sizes = [1, 128], strides = [1, 1]} : vector<16x128xf32> to vector<1x128xf32>
    %48 = vector.shape_cast %47 : vector<1x128xf32> to vector<128xf32>
    %49 = vector.shape_cast %48 : vector<128xf32> to vector<1x1x128xf32>
    %50 = vector.broadcast %49 : vector<1x1x128xf32> to vector<16x10x128xf32>
    %51 = arith.mulf %46, %50 : vector<16x10x128xf32>
    %52 = arith.addf %25, %51 : vector<16x10x128xf32>
    %c4 = arith.constant 4 : index
    %c0_22 = arith.constant 0 : index
    %c0_23 = arith.constant 0 : index
    %c0_24 = arith.constant 0 : index
    %53 = vector.load %arg1[%c4, %c0_22, %c0_23, %c0_24] : memref<6x16x10x128xbf16, #tpu.memory_space<vmem>>, vector<1x16x10x128xbf16>
    %54 = vector.shape_cast %53 : vector<1x16x10x128xbf16> to vector<16x10x128xbf16>
    %55 = arith.extf %54 : vector<16x10x128xbf16> to vector<16x10x128xf32>
    %56 = vector.extract_strided_slice %0 {offsets = [6, 0], sizes = [1, 128], strides = [1, 1]} : vector<16x128xf32> to vector<1x128xf32>
    %57 = vector.shape_cast %56 : vector<1x128xf32> to vector<128xf32>
    %58 = vector.shape_cast %57 : vector<128xf32> to vector<1x1x128xf32>
    %59 = vector.broadcast %58 : vector<1x1x128xf32> to vector<16x10x128xf32>
    %60 = arith.mulf %55, %59 : vector<16x10x128xf32>
    %61 = arith.addf %43, %60 : vector<16x10x128xf32>
    %c5 = arith.constant 5 : index
    %c0_25 = arith.constant 0 : index
    %c0_26 = arith.constant 0 : index
    %c0_27 = arith.constant 0 : index
    %62 = vector.load %arg1[%c5, %c0_25, %c0_26, %c0_27] : memref<6x16x10x128xbf16, #tpu.memory_space<vmem>>, vector<1x16x10x128xbf16>
    %63 = vector.shape_cast %62 : vector<1x16x10x128xbf16> to vector<16x10x128xbf16>
    %64 = arith.extf %63 : vector<16x10x128xbf16> to vector<16x10x128xf32>
    %65 = vector.extract_strided_slice %0 {offsets = [7, 0], sizes = [1, 128], strides = [1, 1]} : vector<16x128xf32> to vector<1x128xf32>
    %66 = vector.shape_cast %65 : vector<1x128xf32> to vector<128xf32>
    %67 = vector.shape_cast %66 : vector<128xf32> to vector<1x1x128xf32>
    %68 = vector.broadcast %67 : vector<1x1x128xf32> to vector<16x10x128xf32>
    %69 = arith.mulf %64, %68 : vector<16x10x128xf32>
    %70 = arith.addf %61, %69 : vector<16x10x128xf32>
    %c4_28 = arith.constant 4 : index
    %c0_29 = arith.constant 0 : index
    %c0_30 = arith.constant 0 : index
    %c0_31 = arith.constant 0 : index
    %71 = vector.load %arg1[%c4_28, %c0_29, %c0_30, %c0_31] : memref<6x16x10x128xbf16, #tpu.memory_space<vmem>>, vector<1x16x10x128xbf16>
    %72 = vector.shape_cast %71 : vector<1x16x10x128xbf16> to vector<16x10x128xbf16>
    %73 = arith.extf %72 : vector<16x10x128xbf16> to vector<16x10x128xf32>
    %74 = vector.extract_strided_slice %0 {offsets = [8, 0], sizes = [1, 128], strides = [1, 1]} : vector<16x128xf32> to vector<1x128xf32>
    %75 = vector.shape_cast %74 : vector<1x128xf32> to vector<128xf32>
    %76 = vector.shape_cast %75 : vector<128xf32> to vector<1x1x128xf32>
    %77 = vector.broadcast %76 : vector<1x1x128xf32> to vector<16x10x128xf32>
    %78 = arith.mulf %73, %77 : vector<16x10x128xf32>
    %79 = arith.addf %52, %78 : vector<16x10x128xf32>
    %80 = vector.extract_strided_slice %70 {offsets = [0, 0, 0], sizes = [16, 8, 128], strides = [1, 1, 1]} : vector<16x10x128xf32> to vector<16x8x128xf32>
    %81 = vector.extract_strided_slice %79 {offsets = [0, 1, 0], sizes = [16, 8, 128], strides = [1, 1, 1]} : vector<16x10x128xf32> to vector<16x8x128xf32>
    %82 = arith.addf %80, %81 : vector<16x8x128xf32>
    %83 = arith.truncf %82 : vector<16x8x128xf32> to vector<16x8x128xbf16>
    %c0_32 = arith.constant 0 : index
    %c0_33 = arith.constant 0 : index
    %c0_34 = arith.constant 0 : index
    %84 = vector.load %arg3[%c0_32, %c0_33, %c0_34] : memref<16x8x128xbf16, #tpu.memory_space<vmem>>, vector<16x8x128xbf16>
    tpu.vector_store %arg3[%c0_32, %c0_33, %c0_34], %83 {strides = array<i32>} : memref<16x8x128xbf16, #tpu.memory_space<vmem>>, vector<16x8x128xbf16>,
    %85 = vector.shape_cast %82 : vector<16x8x128xf32> to vector<128x128xf32>
    %cst = arith.constant 1.000000e+00 : f32
    %86 = vector.broadcast %cst : f32 to vector<1x128xf32>
    %cst_35 = arith.constant dense<0.000000e+00> : vector<1x128xf32>
    %87 = tpu.matmul %86, %85, %cst_35 {dimension_numbers = #tpu.dot_dimension_numbers<[1], [0], [0], [1], [0, 0, 1, 1], [], []>} : vector<1x128xf32>, vector<128x128xf32>, vector<1x128xf32> -> vector<1x128xf32>
    %c0_36 = arith.constant 0 : index
    %c0_37 = arith.constant 0 : index
    %c0_38 = arith.constant 0 : index
    %88 = vector.load %arg4[%c0_36, %c0_37, %c0_38] : memref<1x2x128xf32, #tpu.memory_space<vmem>>, vector<1x1x128xf32>
    %89 = vector.shape_cast %88 : vector<1x1x128xf32> to vector<1x128xf32>
    %90 = vector.shape_cast %87 : vector<1x128xf32> to vector<1x1x128xf32>
    tpu.vector_store %arg4[%c0_36, %c0_37, %c0_38], %90 {strides = array<i32>} : memref<1x2x128xf32, #tpu.memory_space<vmem>>, vector<1x1x128xf32>,
    %91 = arith.mulf %85, %85 : vector<128x128xf32>
    %cst_39 = arith.constant dense<0.000000e+00> : vector<1x128xf32>
    %92 = tpu.matmul %86, %91, %cst_39 {dimension_numbers = #tpu.dot_dimension_numbers<[1], [0], [0], [1], [0, 0, 1, 1], [], []>} : vector<1x128xf32>, vector<128x128xf32>, vector<1x128xf32> -> vector<1x128xf32>
    %c0_40 = arith.constant 0 : index
    %c1_41 = arith.constant 1 : index
    %c0_42 = arith.constant 0 : index
    %93 = vector.load %arg4[%c0_40, %c1_41, %c0_42] : memref<1x2x128xf32, #tpu.memory_space<vmem>>, vector<1x1x128xf32>
    %94 = vector.shape_cast %93 : vector<1x1x128xf32> to vector<1x128xf32>
    %95 = vector.shape_cast %92 : vector<1x128xf32> to vector<1x1x128xf32>
    tpu.vector_store %arg4[%c0_40, %c1_41, %c0_42], %95 {strides = array<i32>} : memref<1x2x128xf32, #tpu.memory_space<vmem>>, vector<1x1x128xf32>,
    return
  }
  func.func @transform_0(%arg0: i32) -> (i32, i32, i32, i32) {
    %c0_i32 = arith.constant 0 : i32
    %c0_i32_0 = arith.constant 0 : i32
    %c0_i32_1 = arith.constant 0 : i32
    %c0_i32_2 = arith.constant 0 : i32
    return %c0_i32, %arg0, %c0_i32_0, %c0_i32_1 : i32, i32, i32, i32
  }
  func.func @transform_1(%arg0: i32) -> (i32, i32) {
    %c0_i32 = arith.constant 0 : i32
    %c0_i32_0 = arith.constant 0 : i32
    %c0_i32_1 = arith.constant 0 : i32
    return %c0_i32, %c0_i32_0 : i32, i32
  }
  func.func @transform_2(%arg0: i32) -> (i32, i32, i32) {
    %c0_i32 = arith.constant 0 : i32
    %c0_i32_0 = arith.constant 0 : i32
    %c0_i32_1 = arith.constant 0 : i32
    return %arg0, %c0_i32, %c0_i32_0 : i32, i32, i32
  }
  func.func @transform_3(%arg0: i32) -> (i32, i32, i32) {
    %c0_i32 = arith.constant 0 : i32
    %c0_i32_0 = arith.constant 0 : i32
    %c0_i32_1 = arith.constant 0 : i32
    return %arg0, %c0_i32, %c0_i32_0 : i32, i32, i32
  }
}

module attributes {stable_mosaic.version = 11 : i64} {
  func.func @pw_kernel(%arg0: i32, %arg1: memref<128x128xbf16, #tpu.memory_space<vmem>>, %arg2: memref<8x128xf32, #tpu.memory_space<vmem>>, %arg3: memref<128x128xbf16, #tpu.memory_space<vmem>>, %arg4: memref<128x128xf32, #tpu.memory_space<vmem>>, %arg5: memref<1x2x128xf32, #tpu.memory_space<vmem>>) attributes {dimension_semantics = [#tpu.dimension_semantics<parallel>], iteration_bounds = array<i64: 1>, scalar_prefetch = 0 : i64, scratch_operands = 0 : i64, tpu.core_type = #tpu.core_type<tc>, window_params = [{transform_indices = @transform_0, window_bounds = array<i64: 128, 128>}, {pipeline_mode = #tpu.pipeline_mode<synchronous>, transform_indices = @transform_1, window_bounds = array<i64: 8, 128>}, {pipeline_mode = #tpu.pipeline_mode<synchronous>, transform_indices = @transform_2, window_bounds = array<i64: 128, 128>}, {transform_indices = @transform_3, window_bounds = array<i64: 128, 128>}, {transform_indices = @transform_4, window_bounds = array<i64: 1, 2, 128>}]} {
    %c0 = arith.constant 0 : index
    %c0_0 = arith.constant 0 : index
    %0 = vector.load %arg1[%c0, %c0_0] : memref<128x128xbf16, #tpu.memory_space<vmem>>, vector<128x128xbf16>
    %1 = arith.extf %0 : vector<128x128xbf16> to vector<128x128xf32>
    %c0_1 = arith.constant 0 : index
    %c0_2 = arith.constant 0 : index
    %2 = vector.load %arg2[%c0_1, %c0_2] : memref<8x128xf32, #tpu.memory_space<vmem>>, vector<1x128xf32>
    %3 = vector.broadcast %2 : vector<1x128xf32> to vector<128x128xf32>
    %4 = arith.mulf %1, %3 : vector<128x128xf32>
    %c1 = arith.constant 1 : index
    %c0_3 = arith.constant 0 : index
    %5 = vector.load %arg2[%c1, %c0_3] : memref<8x128xf32, #tpu.memory_space<vmem>>, vector<1x128xf32>
    %6 = vector.broadcast %5 : vector<1x128xf32> to vector<128x128xf32>
    %7 = arith.addf %4, %6 : vector<128x128xf32>
    %cst = arith.constant 0.000000e+00 : f32
    %8 = vector.broadcast %cst : f32 to vector<128x128xf32>
    %9 = arith.maximumf %7, %8 : vector<128x128xf32>
    %10 = arith.truncf %9 : vector<128x128xf32> to vector<128x128xbf16>
    %c0_4 = arith.constant 0 : index
    %c0_5 = arith.constant 0 : index
    %11 = vector.load %arg3[%c0_4, %c0_5] : memref<128x128xbf16, #tpu.memory_space<vmem>>, vector<128x128xbf16>
    %cst_6 = arith.constant dense<0.000000e+00> : vector<128x128xf32>
    %12 = tpu.matmul %10, %11, %cst_6 {dimension_numbers = #tpu.dot_dimension_numbers<[1], [0], [0], [1], [0, 0, 1, 1], [], []>} : vector<128x128xbf16>, vector<128x128xbf16>, vector<128x128xf32> -> vector<128x128xf32>
    %c0_7 = arith.constant 0 : index
    %c0_8 = arith.constant 0 : index
    %13 = vector.load %arg4[%c0_7, %c0_8] : memref<128x128xf32, #tpu.memory_space<vmem>>, vector<128x128xf32>
    tpu.vector_store %arg4[%c0_7, %c0_8], %12 {strides = array<i32>} : memref<128x128xf32, #tpu.memory_space<vmem>>, vector<128x128xf32>,
    %cst_9 = arith.constant dense<0.000000e+00> : vector<128xf32>
    %14 = vector.multi_reduction <add>, %12, %cst_9 [0] : vector<128x128xf32> to vector<128xf32>
    %15 = vector.shape_cast %14 : vector<128xf32> to vector<1x128xf32>
    %c0_10 = arith.constant 0 : index
    %c0_11 = arith.constant 0 : index
    %c0_12 = arith.constant 0 : index
    %16 = vector.load %arg5[%c0_10, %c0_11, %c0_12] : memref<1x2x128xf32, #tpu.memory_space<vmem>>, vector<1x1x128xf32>
    %17 = vector.shape_cast %16 : vector<1x1x128xf32> to vector<1x128xf32>
    %18 = vector.shape_cast %15 : vector<1x128xf32> to vector<1x1x128xf32>
    tpu.vector_store %arg5[%c0_10, %c0_11, %c0_12], %18 {strides = array<i32>} : memref<1x2x128xf32, #tpu.memory_space<vmem>>, vector<1x1x128xf32>,
    %19 = arith.mulf %12, %12 : vector<128x128xf32>
    %cst_13 = arith.constant dense<0.000000e+00> : vector<128xf32>
    %20 = vector.multi_reduction <add>, %19, %cst_13 [0] : vector<128x128xf32> to vector<128xf32>
    %21 = vector.shape_cast %20 : vector<128xf32> to vector<1x128xf32>
    %c0_14 = arith.constant 0 : index
    %c1_15 = arith.constant 1 : index
    %c0_16 = arith.constant 0 : index
    %22 = vector.load %arg5[%c0_14, %c1_15, %c0_16] : memref<1x2x128xf32, #tpu.memory_space<vmem>>, vector<1x1x128xf32>
    %23 = vector.shape_cast %22 : vector<1x1x128xf32> to vector<1x128xf32>
    %24 = vector.shape_cast %21 : vector<1x128xf32> to vector<1x1x128xf32>
    tpu.vector_store %arg5[%c0_14, %c1_15, %c0_16], %24 {strides = array<i32>} : memref<1x2x128xf32, #tpu.memory_space<vmem>>, vector<1x1x128xf32>,
    return
  }
  func.func @transform_0(%arg0: i32) -> (i32, i32) {
    %c0_i32 = arith.constant 0 : i32
    %c0_i32_0 = arith.constant 0 : i32
    return %arg0, %c0_i32 : i32, i32
  }
  func.func @transform_1(%arg0: i32) -> (i32, i32) {
    %c0_i32 = arith.constant 0 : i32
    %c0_i32_0 = arith.constant 0 : i32
    %c0_i32_1 = arith.constant 0 : i32
    return %c0_i32, %c0_i32_0 : i32, i32
  }
  func.func @transform_2(%arg0: i32) -> (i32, i32) {
    %c0_i32 = arith.constant 0 : i32
    %c0_i32_0 = arith.constant 0 : i32
    %c0_i32_1 = arith.constant 0 : i32
    return %c0_i32, %c0_i32_0 : i32, i32
  }
  func.func @transform_3(%arg0: i32) -> (i32, i32) {
    %c0_i32 = arith.constant 0 : i32
    %c0_i32_0 = arith.constant 0 : i32
    return %arg0, %c0_i32 : i32, i32
  }
  func.func @transform_4(%arg0: i32) -> (i32, i32, i32) {
    %c0_i32 = arith.constant 0 : i32
    %c0_i32_0 = arith.constant 0 : i32
    %c0_i32_1 = arith.constant 0 : i32
    return %arg0, %c0_i32, %c0_i32_0 : i32, i32, i32
  }
}

</mosaic_0001>

<bundles_post_ra>
// kernel: depthwise_separable_conv.3
= control target key start
LH: loop header
LB: loop body
LE: loop exit
PB: predicated region body
PF: predicated region fallthrough
CT: control target
= control target key end

     0   :  { %s650_s2 = inlined_call_operand.vmem [shape: bf16[128,128], index: 2, kind: input, shape index: {}]   ;;  %s651_s0 = inlined_call_operand.vmem [shape: bf16[128,128], index: 0, kind: input, shape index: {}]   ;;  %s652_s1 = inlined_call_operand.vmem [shape: f32[8,128], index: 1, kind: input, shape index: {}]   ;;  %s653_s3 = inlined_call_operand.vmem [shape: f32[128,128], index: 3, kind: output, shape index: {0}]   ;;  %s654_s4 = inlined_call_operand.vmem [shape: f32[1,2,128], index: 4, kind: output, shape index: {1}]  }
   0x1   :  { %v473_v0 = vld [vmem:[%s650_s2] sm:$0xff]   ;;  %v474_v1 = vld [vmem:[%s650_s2 + $0x8] sm:$0xff]   ;;  %v475_v2 = vld [vmem:[%s650_s2 + $0x10] sm:$0xff]  }
   0x2   :  { %425 = vmatprep.subr.bf16.mxu0 %v473_v0  ;;  %457 = vmatprep.subr.bf16.mxu1 %v473_v0  ;;  %v476_v3 = vld [vmem:[%s650_s2 + $0x18] sm:$0xff]   ;;  %v371_v4 = vld [vmem:[%s651_s0] sm:$0xff]   ;;  %v402_v8 = vld [vmem:[%s651_s0 + $0x8] sm:$0xff]  }
   0x3   :  { %426 = vmatpush3.bf16.msra.mxu0 %v473_v0  ;;  %465 = vmatpush3.bf16.msra.mxu1 %v473_v0  ;;  %v524_v5 = vld [vmem:[%s652_s1] ss:$0 sm:$0xff]  ;;  %v372_v6 = vunpack.c.l.bf16 %v371_v4  ;;  %v373_v7 = vunpack.c.h.bf16 %v371_v4  ;;  %v403_v9 = vld [vmem:[%s651_s0 + $0x10] sm:$0xff]   ;;  %v535_v10 = vld [vmem:[%s652_s1 + $0x1] ss:$0 sm:$0xff]  ;;  %v376_v11 = vunpack.c.l.bf16 %v402_v8  ;;  %v377_v14 = vunpack.c.h.bf16 %v402_v8 }
   0x4   :  { %427 = vmatprep.subr.bf16.mxu0 %v474_v1  ;;  %458 = vmatprep.subr.bf16.mxu1 %v474_v1  ;;  %v405_v15 = vld [vmem:[%s651_s0 + $0x20] sm:$0xff]   ;;  %v380_v17 = vunpack.c.l.bf16 %v403_v9  ;;  %v381_v21 = vunpack.c.h.bf16 %v403_v9  ;;  %v404_v22 = vld [vmem:[%s651_s0 + $0x18] sm:$0xff]   ;;  %v406_v27 = vld [vmem:[%s651_s0 + $0x28] sm:$0xff]  }
   0x5   :  { %v54_v12 = vmul.f32 %v372_v6, %v524_v5  ;;  %v55_v13 = vmul.f32 %v373_v7, %v524_v5  ;;  %v477_v16 = vld [vmem:[%s650_s2 + $0x20] sm:$0xff]   ;;  %v56_v20 = vmul.f32 %v376_v11, %v524_v5  ;;  %v388_v23 = vunpack.c.l.bf16 %v405_v15  ;;  %v478_v28 = vld [vmem:[%s650_s2 + $0x28] sm:$0xff]   ;;  %v407_v30 = vld [vmem:[%s651_s0 + $0x30] sm:$0xff]  }
   0x6   :  { %v57_v26 = vmul.f32 %v377_v14, %v524_v5  ;;  %v58_v29 = vmul.f32 %v380_v17, %v524_v5  ;;  %v384_v32 = vunpack.c.l.bf16 %v404_v22  ;;  %v385_v33 = vunpack.c.h.bf16 %v404_v22  ;;  %v408_v39 = vld [vmem:[%s651_s0 + $0x38] sm:$0xff]   ;;  %v479_v44 = vld [vmem:[%s650_s2 + $0x30] sm:$0xff]  }
   0x7   :  { %428 = vmatpush3.bf16.msra.mxu0 %v474_v1  ;;  %466 = vmatpush3.bf16.msra.mxu1 %v474_v1  ;;  %v75_v18 = vadd.f32 %v535_v10, %v54_v12  ;;  %v76_v19 = vadd.f32 %v535_v10, %v55_v13  ;;  %v389_v34 = vunpack.c.h.bf16 %v405_v15  ;;  %v77_v35 = vadd.f32 %v535_v10, %v56_v20  ;;  %v480_v61 = vld [vmem:[%s650_s2 + $0x38] sm:$0xff]  }
   0x8   :  { %429 = vmatprep.subr.bf16.mxu0 %v475_v2  ;;  %459 = vmatprep.subr.bf16.mxu1 %v475_v2  ;;  %v59_v36 = vmul.f32 %v381_v21, %v524_v5  ;;  %v62_v37 = vmul.f32 %v388_v23, %v524_v5  ;;  %v392_v38 = vunpack.c.l.bf16 %v406_v27  ;;  %v78_v40 = vadd.f32 %v535_v10, %v57_v26 }
   0x9   :  { %v91_v24 = vmax.f32 %v75_v18, 0.0  ;;  %v92_v25 = vmax.f32 %v76_v19, 0.0  ;;  %v63_v41 = vmul.f32 %v389_v34, %v524_v5  ;;  %v393_v42 = vunpack.c.h.bf16 %v406_v27 }
   0xa   :  { %v396_v43 = vunpack.c.l.bf16 %v407_v30  ;;  %v79_v45 = vadd.f32 %v535_v10, %v58_v29  ;;  %v83_v46 = vadd.f32 %v535_v10, %v62_v37  ;;  %v64_v47 = vmul.f32 %v392_v38, %v524_v5 }
   0xb   :  { %430 = vmatpush3.bf16.msra.mxu0 %v475_v2  ;;  %467 = vmatpush3.bf16.msra.mxu1 %v475_v2  ;;  %v107_v31 = vpack.c.bf16 %v92_v25, %v91_v24  ;;  %v397_v48 = vunpack.c.h.bf16 %v407_v30  ;;  %v84_v49 = vadd.f32 %v535_v10, %v63_v41  ;;  %v65_v50 = vmul.f32 %v393_v42, %v524_v5 }
   0xc   :  { %431 = vmatprep.subr.bf16.mxu0 %v476_v3  ;;  %460 = vmatprep.subr.bf16.mxu1 %v476_v3  ;;  %v66_v51 = vmul.f32 %v396_v43, %v524_v5  ;;  %v400_v52 = vunpack.c.l.bf16 %v408_v39  ;;  %v99_v53 = vmax.f32 %v83_v46, 0.0  ;;  %v85_v54 = vadd.f32 %v535_v10, %v64_v47 }
   0xd   :  { %441 = vmatprep.mubr.bf16.mxu0 %v107_v31  ;;  %v67_v55 = vmul.f32 %v397_v48, %v524_v5  ;;  %v401_v56 = vunpack.c.h.bf16 %v408_v39  ;;  %v80_v57 = vadd.f32 %v535_v10, %v59_v36  ;;  %v100_v58 = vmax.f32 %v84_v49, 0.0 }
   0xe   :  { %v86_v59 = vadd.f32 %v535_v10, %v65_v50  ;;  %v87_v60 = vadd.f32 %v535_v10, %v66_v51  ;;  %v60_v62 = vmul.f32 %v384_v32, %v524_v5  ;;  %v93_v0 = vmax.f32 %v77_v35, 0.0 }
   0xf   :  { %432 = vmatpush3.bf16.msra.mxu0 %v476_v3  ;;  %468 = vmatpush3.bf16.msra.mxu1 %v476_v3  ;;  %v88_v63 = vadd.f32 %v535_v10, %v67_v55  ;;  %v94_v1 = vmax.f32 %v78_v40, 0.0  ;;  %v61_v2 = vmul.f32 %v385_v33, %v524_v5  ;;  %v111_v3 = vpack.c.bf16 %v100_v58, %v99_v53 }
  0x10   :  { %433 = vmatprep.subr.bf16.mxu0 %v477_v16  ;;  %461 = vmatprep.subr.bf16.mxu1 %v477_v16  ;;  %v101_v4 = vmax.f32 %v85_v54, 0.0  ;;  %v102_v6 = vmax.f32 %v86_v59, 0.0  ;;  %v68_v7 = vmul.f32 %v400_v52, %v524_v5  ;;  %v69_v8 = vmul.f32 %v401_v56, %v524_v5 }
  0x11   :  { %v95_v9 = vmax.f32 %v79_v45, 0.0  ;;  %v96_v11 = vmax.f32 %v80_v57, 0.0  ;;  %v103_v12 = vmax.f32 %v87_v60, 0.0  ;;  %v104_v13 = vmax.f32 %v88_v63, 0.0  ;;  %449 = vmatprep.mubr.bf16.mxu1 %v111_v3 }
  0x12   :  { %v81_v14 = vadd.f32 %v535_v10, %v60_v62  ;;  %v82_v15 = vadd.f32 %v535_v10, %v61_v2  ;;  %v112_v17 = vpack.c.bf16 %v102_v6, %v101_v4  ;;  %v89_v18 = vadd.f32 %v535_v10, %v68_v7 }
  0x13   :  { %434 = vmatpush3.bf16.msra.mxu0 %v477_v16  ;;  %469 = vmatpush3.bf16.msra.mxu1 %v477_v16  ;;  %v108_v16 = vpack.c.bf16 %v94_v1, %v93_v0  ;;  %v90_v19 = vadd.f32 %v535_v10, %v69_v8  ;;  %v109_v5 = vpack.c.bf16 %v96_v11, %v95_v9 }
  0x14   :  { %435 = vmatprep.subr.bf16.mxu0 %v478_v28  ;;  %462 = vmatprep.subr.bf16.mxu1 %v478_v28  ;;  %v113_v20 = vpack.c.bf16 %v104_v13, %v103_v12  ;;  %v97_v21 = vmax.f32 %v81_v14, 0.0  ;;  %v98_v22 = vmax.f32 %v82_v15, 0.0  ;;  %v105_v23 = vmax.f32 %v89_v18, 0.0 }
  0x15   :  { %v106_v24 = vmax.f32 %v90_v19, 0.0 }
  0x16   :  { %v110_v25 = vpack.c.bf16 %v98_v22, %v97_v21 }
  0x17   :  { %436 = vmatpush3.bf16.msra.mxu0 %v478_v28  ;;  %470 = vmatpush3.bf16.msra.mxu1 %v478_v28  ;;  %v114_v26 = vpack.c.bf16 %v106_v24, %v105_v23 }
  0x18   :  { %437 = vmatprep.subr.bf16.mxu0 %v479_v44  ;;  %463 = vmatprep.subr.bf16.mxu1 %v479_v44 }
  0x1b   :  { %438 = vmatpush3.bf16.msra.mxu0 %v479_v44  ;;  %471 = vmatpush3.bf16.msra.mxu1 %v479_v44 }
  0x1c   :  { %439 = vmatprep.subr.bf16.mxu0 %v480_v61  ;;  %464 = vmatprep.subr.bf16.mxu1 %v480_v61 }
  0x1f   :  { %440 = vmatpush3.bf16.msra.mxu0 %v480_v61  ;;  %472 = vmatpush3.bf16.msra.mxu1 %v480_v61 }
  0x22   :  { %442 = vmatmul.mubr.bf16.vlgmr.msra.gmra.mrb[0].mxu0 %v108_v16  ;;  %450 = vmatmul.mubr.bf16.vlgmr.msra.gmra.mrb[0].mxu1 %v112_v17 }
  0x23   :  { %445 = vmatprep.mubr.bf16.mxu0 %v109_v5  ;;  %453 = vmatprep.mubr.bf16.mxu1 %v113_v20 }
  0x2a   :  { %446 = vmatmul.mubr.bf16.gmra.mrb[4].mxu0 %v110_v25  ;;  %454 = vmatmul.mubr.bf16.gmra.mrb[4].mxu1 %v114_v26 }
  0xf5   :  { %v443_v27 = vpop.f32.mrb[0].mxu0  ;;  %v451_v28 = vpop.f32.mrb[0].mxu1 }
  0xf6   :  { %278 = vst [vmem:[%s653_s3 + $0x10] sm:$0xff] %v443_v27  ;;  %v213_v10 = vpop.f32.mrb[1].mxu0  ;;  %286 = vst [vmem:[%s653_s3 + $0x50] sm:$0xff] %v451_v28  ;;  %v245_v29 = vpop.f32.mrb[1].mxu1  ;;  %v316_v37 = vmul.f32 %v443_v27, %v443_v27  ;;  %v324_v6 = vmul.f32 %v451_v28, %v451_v28 }
  0xf7   :  { %276 = vst [vmem:[%s653_s3] sm:$0xff] %v213_v10  ;;  %v444_v30 = vpop.f32.mrb[2].mxu0  ;;  %284 = vst [vmem:[%s653_s3 + $0x40] sm:$0xff] %v245_v29  ;;  %v452_v31 = vpop.f32.mrb[2].mxu1  ;;  %v314_v34 = vmul.f32 %v213_v10, %v213_v10  ;;  %v322_v63 = vmul.f32 %v245_v29, %v245_v29 }
  0xf8   :  { %279 = vst [vmem:[%s653_s3 + $0x18] sm:$0xff] %v444_v30  ;;  %v216_v32 = vpop.f32.mrb[3].mxu0  ;;  %287 = vst [vmem:[%s653_s3 + $0x58] sm:$0xff] %v452_v31  ;;  %v248_v33 = vpop.f32.mrb[3].mxu1  ;;  %v317_v40 = vmul.f32 %v444_v30, %v444_v30  ;;  %v325_v9 = vmul.f32 %v452_v31, %v452_v31 }
  0xf9   :  { %277 = vst [vmem:[%s653_s3 + $0x8] sm:$0xff] %v216_v32  ;;  %v292_v35 = vadd.f32 %v216_v32, %v213_v10  ;;  %v315_v36 = vmul.f32 %v216_v32, %v216_v32  ;;  %285 = vst [vmem:[%s653_s3 + $0x48] sm:$0xff] %v248_v33  ;;  %v323_v4 = vmul.f32 %v248_v33, %v248_v33 }
  0xfb   :  { %v293_v38 = vadd.f32 %v443_v27, %v292_v35  ;;  %v330_v39 = vadd.f32 %v315_v36, %v314_v34 }
  0xfd   :  { %v331_v41 = vadd.f32 %v330_v39, %v316_v37  ;;  %v447_v42 = vpop.f32.mrb[4].mxu0  ;;  %v294_v43 = vadd.f32 %v444_v30, %v293_v38  ;;  %v455_v44 = vpop.f32.mrb[4].mxu1 }
  0xfe   :  { %282 = vst [vmem:[%s653_s3 + $0x30] sm:$0xff] %v447_v42  ;;  %v229_v45 = vpop.f32.mrb[5].mxu0  ;;  %290 = vst [vmem:[%s653_s3 + $0x70] sm:$0xff] %v455_v44  ;;  %v261_v46 = vpop.f32.mrb[5].mxu1  ;;  %v320_v57 = vmul.f32 %v447_v42, %v447_v42  ;;  %v328_v19 = vmul.f32 %v455_v44, %v455_v44 }
  0xff   :  { %280 = vst [vmem:[%s653_s3 + $0x20] sm:$0xff] %v229_v45  ;;  %v295_v47 = vadd.f32 %v294_v43, %v229_v45  ;;  %v318_v48 = vmul.f32 %v229_v45, %v229_v45  ;;  %v332_v49 = vadd.f32 %v331_v41, %v317_v40  ;;  %v448_v50 = vpop.f32.mrb[6].mxu0  ;;  %288 = vst [vmem:[%s653_s3 + $0x60] sm:$0xff] %v261_v46  ;;  %v456_v51 = vpop.f32.mrb[6].mxu1 }
 0x100   :  { %283 = vst [vmem:[%s653_s3 + $0x38] sm:$0xff] %v448_v50  ;;  %v232_v52 = vpop.f32.mrb[7].mxu0  ;;  %291 = vst [vmem:[%s653_s3 + $0x78] sm:$0xff] %v456_v51  ;;  %v264_v53 = vpop.f32.mrb[7].mxu1  ;;  %v321_v60 = vmul.f32 %v448_v50, %v448_v50  ;;  %v326_v13 = vmul.f32 %v261_v46, %v261_v46  ;;  %v329_v21 = vmul.f32 %v456_v51, %v456_v51 }
 0x101   :  { %v333_v54 = vadd.f32 %v332_v49, %v318_v48  ;;  %281 = vst [vmem:[%s653_s3 + $0x28] sm:$0xff] %v232_v52  ;;  %v296_v55 = vadd.f32 %v295_v47, %v232_v52  ;;  %v319_v56 = vmul.f32 %v232_v52, %v232_v52  ;;  %289 = vst [vmem:[%s653_s3 + $0x68] sm:$0xff] %v264_v53 }
 0x102   :  { %v327_v18 = vmul.f32 %v264_v53, %v264_v53 }
 0x103   :  { %v297_v58 = vadd.f32 %v447_v42, %v296_v55  ;;  %v334_v59 = vadd.f32 %v333_v54, %v319_v56 }
 0x105   :  { %v335_v61 = vadd.f32 %v334_v59, %v320_v57  ;;  %v298_v62 = vadd.f32 %v448_v50, %v297_v58 }
 0x107   :  { %v299_v0 = vadd.f32 %v298_v62, %v245_v29  ;;  %v336_v1 = vadd.f32 %v335_v61, %v321_v60 }
 0x109   :  { %v337_v2 = vadd.f32 %v336_v1, %v322_v63  ;;  %v300_v3 = vadd.f32 %v299_v0, %v248_v33 }
 0x10b   :  { %v301_v7 = vadd.f32 %v451_v28, %v300_v3  ;;  %v338_v8 = vadd.f32 %v337_v2, %v323_v4 }
 0x10d   :  { %v339_v11 = vadd.f32 %v338_v8, %v324_v6  ;;  %v302_v12 = vadd.f32 %v452_v31, %v301_v7 }
 0x10f   :  { %v303_v14 = vadd.f32 %v302_v12, %v261_v46  ;;  %v340_v15 = vadd.f32 %v339_v11, %v325_v9 }
 0x111   :  { %v341_v16 = vadd.f32 %v340_v15, %v326_v13  ;;  %v304_v17 = vadd.f32 %v303_v14, %v264_v53 }
 0x113   :  { %v305_v5 = vadd.f32 %v455_v44, %v304_v17  ;;  %v342_v20 = vadd.f32 %v341_v16, %v327_v18 }
 0x115   :  { %v306_v22 = vadd.f32 %v456_v51, %v305_v5  ;;  %v343_v23 = vadd.f32 %v342_v20, %v328_v19 }
 0x117   :  { %v307_v24 = vrot.slane %v306_v22, 4  ;;  %v344_v25 = vadd.f32 %v343_v23, %v329_v21 }
 0x119   :  { %v308_v26 = vadd.f32 %v307_v24, %v306_v22  ;;  %v345_v27 = vrot.slane %v344_v25, 4 }
 0x11b   :  { %v309_v28 = vrot.slane %v308_v26, 2  ;;  %v346_v10 = vadd.f32 %v345_v27, %v344_v25 }
 0x11d   :  { %v310_v29 = vadd.f32 %v309_v28, %v308_v26  ;;  %v347_v30 = vrot.slane %v346_v10, 2 }
 0x11f   :  { %v311_v31 = vrot.slane %v310_v29, 1  ;;  %v348_v32 = vadd.f32 %v347_v30, %v346_v10 }
 0x121   :  { %v312_v33 = vadd.f32 %v311_v31, %v310_v29  ;;  %v349_v34 = vrot.slane %v348_v32, 1 }
 0x123   :  { %313 = vst [vmem:[%s654_s4] sm:$0x1] %v312_v33  ;;  %v350_v35 = vadd.f32 %v349_v34, %v348_v32 }
 0x125   :  { %351 = vst [vmem:[%s654_s4 + $0x1] sm:$0x1] %v350_v35 }

// kernel: depthwise_separable_conv.2
= control target key start
LH: loop header
LB: loop body
LE: loop exit
PB: predicated region body
PF: predicated region fallthrough
CT: control target
= control target key end

     0   :  { %v79_v0 = vlaneseq  ;;  %v1306_v1 = vmov 0.0|0.0   ;;  %vm712_vm0 = vcmask 1046528   ;;  %vm1307_vm1 = vmmov 0   ;;  %s1920_s0 = inlined_call_operand.vmem [shape: bf16[6,16,10,128], index: 0, kind: input, shape index: {}]   ;;  %s1921_s1 = inlined_call_operand.vmem [shape: f32[16,128], index: 1, kind: input, shape index: {}]   ;;  %s1922_s2 = inlined_call_operand.vmem [shape: bf16[16,8,128], index: 2, kind: output, shape index: {0}]   ;;  %s1923_s3 = inlined_call_operand.vmem [shape: f32[1,2,128], index: 3, kind: output, shape index: {1}]  }
   0x1   :  { %1254 = vmatprep.subr.bf16.mxu0 %v1306_v1  ;;  %v15_v2 = vld [vmem:[%s1920_s0] ss:$8 sps:$4 sm:$0xff]   ;;  %1278 = vmatprep.subr.bf16.mxu1 %v1306_v1  ;;  %v16_v4 = vld [vmem:[%s1920_s0 + $0x4] sm:$0x1]  ;;  %v18_v5 = vld [vmem:[%s1920_s0 + $0xc] sm:$0x1] }
   0x2   :  { %v1338_v3 = vld [vmem:[%s1921_s1] sm:$0xff]  ;;  %v1346_v6 = vshrl.u32 %v79_v0, 7  ;;  %v47_v7 = vunpack.c.l.bf16 %v15_v2  ;;  %v48_v8 = vunpack.c.l.bf16 %v16_v4  ;;  %v49_v9 = vunpack.c.h.bf16 %v15_v2  ;;  %v1010_v18 = vld [vmem:[%s1920_s0 + $0x10c] sm:$0x1] }
   0x3   :  { %v50_v10 = vunpack.c.l.bf16 %v18_v5  ;;  %v991_v11 = vld [vmem:[%s1920_s0 + $0x80] ss:$8 sps:$4 sm:$0xff]   ;;  %v1008_v13 = vld [vmem:[%s1920_s0 + $0x104] sm:$0x1]  ;;  %v240_v26 = vunpack.c.l.bf16 %v1010_v18  ;;  %v1058_v46 = vld [vmem:[%s1920_s0 + $0x20c] sm:$0x1] }
   0x4   :  { %v1007_v12 = vld [vmem:[%s1920_s0 + $0x100] ss:$8 sps:$4 sm:$0xff]   ;;  %v81_v14 = vsub.s32 0, %v1346_v6  ;;  %v116_v15 = vunpack.c.l.bf16 %v991_v11  ;;  %v117_v16 = vunpack.c.h.bf16 %v991_v11  ;;  %v134_v17 = vsub.s32 1, %v1346_v6  ;;  %v1056_v37 = vld [vmem:[%s1920_s0 + $0x204] sm:$0x1] }
   0x5   :  { %v1039_v19 = vld [vmem:[%s1920_s0 + $0x180] ss:$8 sps:$4 sm:$0xff]   ;;  %v170_v20 = vsub.s32 2, %v1346_v6  ;;  %v237_v21 = vunpack.c.l.bf16 %v1007_v12  ;;  %v238_v22 = vunpack.c.l.bf16 %v1008_v13  ;;  %v239_v23 = vunpack.c.h.bf16 %v1007_v12  ;;  %v19_v12 = vld [vmem:[%s1920_s0 + $0x10] ss:$8 sps:$4 sm:$0xff]  }
   0x6   :  { %v1369_v24 = vrot.slane %v1338_v3, %v81_v14  ;;  %v1372_v25 = vrot.slane %v1338_v3, %v134_v17  ;;  %v271_v27 = vsub.s32 3, %v1346_v6  ;;  %v322_v29 = vunpack.c.l.bf16 %v1039_v19  ;;  %v1055_v36 = vld [vmem:[%s1920_s0 + $0x200] ss:$8 sps:$4 sm:$0xff]   ;;  %v20_v13 = vld [vmem:[%s1920_s0 + $0x14] sm:$0x1] }
   0x7   :  { %v1376_v28 = vrot.slane %v1338_v3, %v170_v20  ;;  %v323_v30 = vunpack.c.h.bf16 %v1039_v19  ;;  %v340_v31 = vsub.s32 4, %v1346_v6  ;;  %v1087_v47 = vld [vmem:[%s1920_s0 + $0x280] ss:$8 sps:$4 sm:$0xff]   ;;  %v376_v48 = vsub.s32 5, %v1346_v6  ;;  %v22_v19 = vld [vmem:[%s1920_s0 + $0x1c] sm:$0x1] }
   0x8   :  { %v83_v32 = vmul.f32 %v1369_v24, %v47_v7  ;;  %v84_v33 = vmul.f32 %v1369_v24, %v49_v9  ;;  %v136_v34 = vmul.f32 %v1372_v25, %v116_v15  ;;  %v137_v35 = vmul.f32 %v1372_v25, %v117_v16 }
   0x9   :  { %v172_v38 = vmul.f32 %v1376_v28, %v47_v7  ;;  %v173_v39 = vmul.f32 %v1376_v28, %v48_v8  ;;  %v174_v40 = vmul.f32 %v1376_v28, %v49_v9  ;;  %v175_v41 = vmul.f32 %v1376_v28, %v50_v10  ;;  %v14_v7 = vld [vmem:[%s1921_s1 + $0x8] sm:$0xff] }
   0xa   :  { %v152_v42 = vadd.f32 %v136_v34, %v83_v32  ;;  %v153_v43 = vadd.f32 %v137_v35, %v84_v33  ;;  %v1394_v44 = vrot.slane %v1338_v3, %v271_v27  ;;  %v1397_v45 = vrot.slane %v1338_v3, %v340_v31 }
   0xb   :  { %v475_v49 = vunpack.c.l.bf16 %v1055_v36  ;;  %v476_v50 = vunpack.c.l.bf16 %v1056_v37  ;;  %v477_v51 = vunpack.c.h.bf16 %v1055_v36  ;;  %v1411_v56 = vrot.slane %v1338_v3, %v376_v48 }
   0xc   :  { %v273_v52 = vmul.f32 %v1394_v44, %v237_v21  ;;  %v274_v53 = vmul.f32 %v1394_v44, %v239_v23  ;;  %v342_v54 = vmul.f32 %v1397_v45, %v322_v29  ;;  %v343_v55 = vmul.f32 %v1397_v45, %v323_v30 }
   0xd   :  { %v478_v57 = vunpack.c.l.bf16 %v1058_v46  ;;  %v509_v58 = vsub.s32 6, %v1346_v6  ;;  %v560_v59 = vunpack.c.l.bf16 %v1087_v47  ;;  %v561_v62 = vunpack.c.h.bf16 %v1087_v47 }
   0xe   :  { %v289_v60 = vadd.f32 %v273_v52, %v152_v42  ;;  %v290_v61 = vadd.f32 %v274_v53, %v153_v43  ;;  %v578_v63 = vsub.s32 7, %v1346_v6  ;;  %v378_v0 = vmul.f32 %v1411_v56, %v237_v21  ;;  %v1012_v52 = vld [vmem:[%s1920_s0 + $0x114] sm:$0x1] }
   0xf   :  { %v379_v2 = vmul.f32 %v1411_v56, %v238_v22  ;;  %v380_v4 = vmul.f32 %v1411_v56, %v239_v23  ;;  %v381_v5 = vmul.f32 %v1411_v56, %v240_v26  ;;  %v1423_v10 = vrot.slane %v1338_v3, %v509_v58 }
  0x10   :  { %v358_v8 = vadd.f32 %v342_v54, %v289_v60  ;;  %v359_v9 = vadd.f32 %v343_v55, %v290_v61  ;;  %v1426_v11 = vrot.slane %v1338_v3, %v578_v63  ;;  %v410_v15 = vadd.f32 %v378_v0, %v172_v38  ;;  %v993_v3 = vld [vmem:[%s1920_s0 + $0x90] ss:$8 sps:$4 sm:$0xff]  }
  0x11   :  { %v411_v16 = vadd.f32 %v379_v2, %v173_v39  ;;  %v412_v17 = vadd.f32 %v380_v4, %v174_v40  ;;  %v413_v18 = vadd.f32 %v381_v5, %v175_v41  ;;  %v511_v20 = vmul.f32 %v1423_v10, %v475_v49  ;;  %v1041_v63 = vld [vmem:[%s1920_s0 + $0x190] ss:$8 sps:$4 sm:$0xff]  }
  0x12   :  { %v512_v21 = vmul.f32 %v1423_v10, %v477_v51  ;;  %v580_v22 = vmul.f32 %v1426_v11, %v560_v59  ;;  %v581_v23 = vmul.f32 %v1426_v11, %v561_v62  ;;  %v1446_v26 = vrot.slane %v14_v7, %v81_v14  ;;  %v1014_v62 = vld [vmem:[%s1920_s0 + $0x11c] sm:$0x1] }
  0x13   :  { %v51_v27 = vunpack.c.l.bf16 %v19_v12  ;;  %v52_v29 = vunpack.c.l.bf16 %v20_v13  ;;  %v53_v30 = vunpack.c.h.bf16 %v19_v12  ;;  %v527_v31 = vadd.f32 %v511_v20, %v358_v8 }
  0x14   :  { %v528_v32 = vadd.f32 %v512_v21, %v359_v9  ;;  %v54_v33 = vunpack.c.l.bf16 %v22_v19  ;;  %v118_v34 = vunpack.c.l.bf16 %v993_v3  ;;  %v616_v35 = vmul.f32 %v1446_v26, %v475_v49  ;;  %v1059_v21 = vld [vmem:[%s1920_s0 + $0x210] ss:$8 sps:$4 sm:$0xff]  }
  0x15   :  { %v617_v36 = vmul.f32 %v1446_v26, %v476_v50  ;;  %v618_v37 = vmul.f32 %v1446_v26, %v477_v51  ;;  %v619_v38 = vmul.f32 %v1446_v26, %v478_v57  ;;  %v596_v39 = vadd.f32 %v580_v22, %v527_v31  ;;  %v1011_v51 = vld [vmem:[%s1920_s0 + $0x110] ss:$8 sps:$4 sm:$0xff]  }
  0x16   :  { %v597_v40 = vadd.f32 %v581_v23, %v528_v32  ;;  %v85_v6 = vmul.f32 %v1369_v24, %v51_v27  ;;  %v86_v14 = vmul.f32 %v1369_v24, %v53_v30  ;;  %v648_v41 = vadd.f32 %v616_v35, %v410_v15  ;;  %v1062_v35 = vld [vmem:[%s1920_s0 + $0x21c] sm:$0x1] }
  0x17   :  { %v649_v42 = vadd.f32 %v617_v36, %v411_v16  ;;  %v650_v43 = vadd.f32 %v618_v37, %v412_v17  ;;  %v651_v46 = vadd.f32 %v619_v38, %v413_v18  ;;  %v119_v47 = vunpack.c.h.bf16 %v993_v3 }
  0x18   :  { %v138_v48 = vmul.f32 %v1372_v25, %v118_v34  ;;  %v176_v49 = vmul.f32 %v1376_v28, %v51_v27  ;;  %v177_v50 = vmul.f32 %v1376_v28, %v52_v29  ;;  %v713_v53 = vrot.slane %v648_v41, 1 }
  0x19   :  { %v714_v54 = vrot.slane %v649_v42, 1  ;;  %v716_v55 = vrot.slane %v650_v43, 1  ;;  %v717_v57 = vrot.slane %v651_v46, 1  ;;  %v139_v58 = vmul.f32 %v1372_v25, %v119_v47 }
  0x1a   :  { %v154_v59 = vadd.f32 %v138_v48, %v85_v6  ;;  %v178_v60 = vmul.f32 %v1376_v28, %v53_v30  ;;  %v179_v61 = vmul.f32 %v1376_v28, %v54_v33  ;;  %v241_v4 = vunpack.c.l.bf16 %v1011_v51  ;;  %v1060_v30 = vld [vmem:[%s1920_s0 + $0x214] sm:$0x1] }
  0x1b   :  { %v715_v0 = vsel %vm712_vm0, %v713_v53, %v714_v54  ;;  %v718_v2 = vsel %vm712_vm0, %v716_v55, %v717_v57  ;;  %v242_v5 = vunpack.c.l.bf16 %v1012_v52  ;;  %v155_v9 = vadd.f32 %v139_v58, %v86_v14  ;;  %v23_v54 = vld [vmem:[%s1920_s0 + $0x20] ss:$8 sps:$4 sm:$0xff]  }
  0x1c   :  { %v777_v7 = vadd.f32 %v715_v0, %v596_v39  ;;  %v778_v8 = vadd.f32 %v718_v2, %v597_v40  ;;  %v243_v12 = vunpack.c.h.bf16 %v1011_v51  ;;  %v244_v13 = vunpack.c.l.bf16 %v1014_v62  ;;  %v1089_v40 = vld [vmem:[%s1920_s0 + $0x290] ss:$8 sps:$4 sm:$0xff]  }
  0x1d   :  { %v275_v15 = vmul.f32 %v1394_v44, %v241_v4  ;;  %v324_v16 = vunpack.c.l.bf16 %v1041_v63  ;;  %v325_v17 = vunpack.c.h.bf16 %v1041_v63  ;;  %v382_v29 = vmul.f32 %v1411_v56, %v241_v4 }
  0x1e   :  { %v1106_v18 = vpack.c.bf16 %v778_v8, %v777_v7  ;;  %v896_v19 = vmul.f32 %v777_v7, %v777_v7  ;;  %v897_v3 = vmul.f32 %v778_v8, %v778_v8  ;;  %v276_v20 = vmul.f32 %v1394_v44, %v243_v12  ;;  %v995_v8 = vld [vmem:[%s1920_s0 + $0xa0] ss:$8 sps:$4 sm:$0xff]  }
  0x1f   :  { %v291_v22 = vadd.f32 %v275_v15, %v154_v59  ;;  %v344_v23 = vmul.f32 %v1397_v45, %v324_v16  ;;  %v345_v27 = vmul.f32 %v1397_v45, %v325_v17  ;;  %v383_v33 = vmul.f32 %v1411_v56, %v242_v5  ;;  %v24_v59 = vld [vmem:[%s1920_s0 + $0x24] sm:$0x1]  ;;  %v26_v5 = vld [vmem:[%s1920_s0 + $0x2c] sm:$0x1] }
  0x20   :  { %1107 = vst [vmem:[%s1922_s2] sm:$0xff] %v1106_v18   ;;  %1256 = vmatpush3.bf16.msra.mxu0 %v1106_v18  ;;  %v1279_v31 = vpack.c.bf16 %v897_v3, %v896_v19  ;;  %v292_v32 = vadd.f32 %v276_v20, %v155_v9  ;;  %v384_v34 = vmul.f32 %v1411_v56, %v243_v12  ;;  %v479_v39 = vunpack.c.l.bf16 %v1059_v21 }
  0x21   :  { %1257 = vmatprep.subr.bf16.mxu0 %v1306_v1  ;;  %v360_v36 = vadd.f32 %v344_v23, %v291_v22  ;;  %v385_v37 = vmul.f32 %v1411_v56, %v244_v13  ;;  %v414_v38 = vadd.f32 %v382_v29, %v176_v49  ;;  %v415_v14 = vadd.f32 %v383_v33, %v177_v50 }
  0x22   :  { %1280 = vmatpush3.bf16.msra.mxu1 %v1279_v31  ;;  %v361_v6 = vadd.f32 %v345_v27, %v292_v32  ;;  %v416_v41 = vadd.f32 %v384_v34, %v178_v60  ;;  %v480_v42 = vunpack.c.l.bf16 %v1060_v30  ;;  %v481_v46 = vunpack.c.h.bf16 %v1059_v21  ;;  %v1015_v31 = vld [vmem:[%s1920_s0 + $0x120] ss:$8 sps:$4 sm:$0xff]  }
  0x23   :  { %v417_v43 = vadd.f32 %v385_v37, %v179_v61  ;;  %v482_v47 = vunpack.c.l.bf16 %v1062_v35  ;;  %v513_v48 = vmul.f32 %v1423_v10, %v479_v39  ;;  %1281 = vmatprep.subr.bf16.mxu1 %v1306_v1  ;;  %v562_v51 = vunpack.c.l.bf16 %v1089_v40  ;;  %v1018_v37 = vld [vmem:[%s1920_s0 + $0x12c] sm:$0x1] }
  0x24   :  { %v563_v52 = vunpack.c.h.bf16 %v1089_v40  ;;  %v620_v49 = vmul.f32 %v1446_v26, %v479_v39  ;;  %v621_v53 = vmul.f32 %v1446_v26, %v480_v42  ;;  %v514_v50 = vmul.f32 %v1423_v10, %v481_v46 }
  0x25   :  { %v529_v55 = vadd.f32 %v513_v48, %v360_v36  ;;  %v622_v57 = vmul.f32 %v1446_v26, %v481_v46  ;;  %v623_v58 = vmul.f32 %v1446_v26, %v482_v47  ;;  %v582_v60 = vmul.f32 %v1426_v11, %v562_v51  ;;  %v1016_v36 = vld [vmem:[%s1920_s0 + $0x124] sm:$0x1] }
  0x26   :  { %v583_v61 = vmul.f32 %v1426_v11, %v563_v52  ;;  %v652_v62 = vadd.f32 %v620_v49, %v414_v38  ;;  %v653_v63 = vadd.f32 %v621_v53, %v415_v14  ;;  %v530_v0 = vadd.f32 %v514_v50, %v361_v6  ;;  %v1043_v14 = vld [vmem:[%s1920_s0 + $0x1a0] ss:$8 sps:$4 sm:$0xff]  }
  0x27   :  { %v654_v2 = vadd.f32 %v622_v57, %v416_v41  ;;  %v655_v4 = vadd.f32 %v623_v58, %v417_v43  ;;  %v55_v7 = vunpack.c.l.bf16 %v23_v54  ;;  %v598_v9 = vadd.f32 %v582_v60, %v529_v55  ;;  %v1063_v60 = vld [vmem:[%s1920_s0 + $0x220] ss:$8 sps:$4 sm:$0xff]  }
  0x28   :  { %v719_v12 = vrot.slane %v652_v62, 1  ;;  %v720_v13 = vrot.slane %v653_v63, 1  ;;  %v56_v15 = vunpack.c.l.bf16 %v24_v59  ;;  %v599_v16 = vadd.f32 %v583_v61, %v530_v0  ;;  %v1064_v61 = vld [vmem:[%s1920_s0 + $0x224] sm:$0x1] }
  0x29   :  { %v722_v17 = vrot.slane %v654_v2, 1  ;;  %v723_v18 = vrot.slane %v655_v4, 1  ;;  %v57_v19 = vunpack.c.h.bf16 %v23_v54  ;;  %v58_v20 = vunpack.c.l.bf16 %v26_v5  ;;  %v1066_v4 = vld [vmem:[%s1920_s0 + $0x22c] sm:$0x1]  ;;  %v1091_v5 = vld [vmem:[%s1920_s0 + $0x2a0] ss:$8 sps:$4 sm:$0xff]  }
  0x2a   :  { %v721_v3 = vsel %vm712_vm0, %v719_v12, %v720_v13  ;;  %v87_v21 = vmul.f32 %v1369_v24, %v55_v7  ;;  %v120_v22 = vunpack.c.l.bf16 %v995_v8  ;;  %v121_v30 = vunpack.c.h.bf16 %v995_v8 }
  0x2b   :  { %v724_v23 = vsel %vm712_vm0, %v722_v17, %v723_v18  ;;  %v779_v27 = vadd.f32 %v721_v3, %v598_v9  ;;  %v88_v29 = vmul.f32 %v1369_v24, %v57_v19  ;;  %v180_v34 = vmul.f32 %v1376_v28, %v55_v7 }
  0x2c   :  { %v780_v32 = vadd.f32 %v724_v23, %v599_v16  ;;  %v140_v33 = vmul.f32 %v1372_v25, %v120_v22  ;;  %v181_v35 = vmul.f32 %v1376_v28, %v56_v15  ;;  %v141_v39 = vmul.f32 %v1372_v25, %v121_v30 }
  0x2d   :  { %v898_v38 = vmul.f32 %v779_v27, %v779_v27  ;;  %v182_v40 = vmul.f32 %v1376_v28, %v57_v19  ;;  %v183_v6 = vmul.f32 %v1376_v28, %v58_v20  ;;  %v245_v46 = vunpack.c.l.bf16 %v1015_v31 }
  0x2e   :  { %v1111_v41 = vpack.c.bf16 %v780_v32, %v779_v27  ;;  %v899_v42 = vmul.f32 %v780_v32, %v780_v32  ;;  %v156_v43 = vadd.f32 %v140_v33, %v87_v21  ;;  %v157_v47 = vadd.f32 %v141_v39, %v88_v29  ;;  %v27_v29 = vld [vmem:[%s1920_s0 + $0x30] ss:$8 sps:$4 sm:$0xff]  }
  0x2f   :  { %v246_v48 = vunpack.c.l.bf16 %v1016_v36  ;;  %v247_v51 = vunpack.c.h.bf16 %v1015_v31  ;;  %v248_v52 = vunpack.c.l.bf16 %v1018_v37  ;;  %v277_v53 = vmul.f32 %v1394_v44, %v245_v46 }
  0x30   :  { %1143 = vst [vmem:[%s1922_s2 + $0x8] sm:$0xff] %v1111_v41   ;;  %1259 = vmatpush3.bf16.msra.mxu0 %v1111_v41  ;;  %v1282_v49 = vpack.c.bf16 %v899_v42, %v898_v38  ;;  %v326_v54 = vunpack.c.l.bf16 %v1043_v14  ;;  %v327_v50 = vunpack.c.h.bf16 %v1043_v14  ;;  %v386_v57 = vmul.f32 %v1411_v56, %v245_v46  ;;  %v30_v14 = vld [vmem:[%s1920_s0 + $0x3c] sm:$0x1]  ;;  %v997_v42 = vld [vmem:[%s1920_s0 + $0xb0] ss:$8 sps:$4 sm:$0xff]  }
  0x31   :  { %1260 = vmatprep.subr.bf16.mxu0 %v1306_v1  ;;  %v278_v55 = vmul.f32 %v1394_v44, %v247_v51  ;;  %v387_v58 = vmul.f32 %v1411_v56, %v246_v48  ;;  %v388_v59 = vmul.f32 %v1411_v56, %v247_v51  ;;  %v293_v62 = vadd.f32 %v277_v53, %v156_v43 }
  0x32   :  { %1283 = vmatpush3.bf16.msra.mxu1 %v1282_v49  ;;  %v346_v63 = vmul.f32 %v1397_v45, %v326_v54  ;;  %v347_v0 = vmul.f32 %v1397_v45, %v327_v50  ;;  %v389_v2 = vmul.f32 %v1411_v56, %v248_v52  ;;  %v418_v8 = vadd.f32 %v386_v57, %v180_v34  ;;  %v28_v34 = vld [vmem:[%s1920_s0 + $0x34] sm:$0x1] }
  0x33   :  { %v294_v7 = vadd.f32 %v278_v55, %v157_v47  ;;  %v419_v9 = vadd.f32 %v387_v58, %v181_v35  ;;  %v420_v12 = vadd.f32 %v388_v59, %v182_v40  ;;  %1284 = vmatprep.subr.bf16.mxu1 %v1306_v1  ;;  %v483_v16 = vunpack.c.l.bf16 %v1063_v60 }
  0x34   :  { %v362_v13 = vadd.f32 %v346_v63, %v293_v62  ;;  %v421_v15 = vadd.f32 %v389_v2, %v183_v6  ;;  %v484_v17 = vunpack.c.l.bf16 %v1064_v61  ;;  %v485_v19 = vunpack.c.h.bf16 %v1063_v60  ;;  %v1019_v62 = vld [vmem:[%s1920_s0 + $0x130] ss:$8 sps:$4 sm:$0xff]  }
  0x35   :  { %v363_v18 = vadd.f32 %v347_v0, %v294_v7  ;;  %v486_v3 = vunpack.c.l.bf16 %v1066_v4  ;;  %v564_v20 = vunpack.c.l.bf16 %v1091_v5  ;;  %v515_v21 = vmul.f32 %v1423_v10, %v483_v16  ;;  %v1022_v7 = vld [vmem:[%s1920_s0 + $0x13c] sm:$0x1] }
  0x36   :  { %v565_v22 = vunpack.c.h.bf16 %v1091_v5  ;;  %v624_v23 = vmul.f32 %v1446_v26, %v483_v16  ;;  %v625_v27 = vmul.f32 %v1446_v26, %v484_v17  ;;  %v516_v30 = vmul.f32 %v1423_v10, %v485_v19  ;;  %v1020_v5 = vld [vmem:[%s1920_s0 + $0x134] sm:$0x1] }
  0x37   :  { %v584_v31 = vmul.f32 %v1426_v11, %v564_v20  ;;  %v626_v32 = vmul.f32 %v1446_v26, %v485_v19  ;;  %v627_v33 = vmul.f32 %v1446_v26, %v486_v3  ;;  %v531_v35 = vadd.f32 %v515_v21, %v362_v13 }
  0x38   :  { %v585_v36 = vmul.f32 %v1426_v11, %v565_v22  ;;  %v656_v37 = vadd.f32 %v624_v23, %v418_v8  ;;  %v657_v38 = vadd.f32 %v625_v27, %v419_v9  ;;  %v532_v39 = vadd.f32 %v516_v30, %v363_v18 }
  0x39   :  { %v658_v40 = vadd.f32 %v626_v32, %v420_v12  ;;  %v659_v6 = vadd.f32 %v627_v33, %v421_v15  ;;  %v59_v41 = vunpack.c.l.bf16 %v27_v29  ;;  %v600_v43 = vadd.f32 %v584_v31, %v531_v35  ;;  %v1045_v15 = vld [vmem:[%s1920_s0 + $0x1b0] ss:$8 sps:$4 sm:$0xff]  }
  0x3a   :  { %v725_v46 = vrot.slane %v656_v37, 1  ;;  %v726_v47 = vrot.slane %v657_v38, 1  ;;  %v60_v48 = vunpack.c.l.bf16 %v28_v34  ;;  %v601_v51 = vadd.f32 %v585_v36, %v532_v39  ;;  %v1067_v35 = vld [vmem:[%s1920_s0 + $0x230] ss:$8 sps:$4 sm:$0xff]   ;;  %v1068_v36 = vld [vmem:[%s1920_s0 + $0x234] sm:$0x1] }
  0x3b   :  { %v728_v52 = vrot.slane %v658_v40, 1  ;;  %v729_v49 = vrot.slane %v659_v6, 1  ;;  %v61_v53 = vunpack.c.h.bf16 %v27_v29  ;;  %v62_v50 = vunpack.c.l.bf16 %v30_v14  ;;  %v1070_v6 = vld [vmem:[%s1920_s0 + $0x23c] sm:$0x1]  ;;  %v1093_v14 = vld [vmem:[%s1920_s0 + $0x2b0] ss:$8 sps:$4 sm:$0xff]  }
  0x3c   :  { %v727_v54 = vsel %vm712_vm0, %v725_v46, %v726_v47  ;;  %v89_v55 = vmul.f32 %v1369_v24, %v59_v41  ;;  %v122_v57 = vunpack.c.l.bf16 %v997_v42  ;;  %v123_v61 = vunpack.c.h.bf16 %v997_v42 }
  0x3d   :  { %v730_v58 = vsel %vm712_vm0, %v728_v52, %v729_v49  ;;  %v781_v59 = vadd.f32 %v727_v54, %v600_v43  ;;  %v90_v60 = vmul.f32 %v1369_v24, %v61_v53  ;;  %v184_v2 = vmul.f32 %v1376_v28, %v59_v41 }
  0x3e   :  { %v782_v63 = vadd.f32 %v730_v58, %v601_v51  ;;  %v142_v0 = vmul.f32 %v1372_v25, %v122_v57  ;;  %v185_v4 = vmul.f32 %v1376_v28, %v60_v48  ;;  %v143_v9 = vmul.f32 %v1372_v25, %v123_v61 }
  0x3f   :  { %v900_v8 = vmul.f32 %v781_v59, %v781_v59  ;;  %v186_v12 = vmul.f32 %v1376_v28, %v61_v53  ;;  %v187_v13 = vmul.f32 %v1376_v28, %v62_v50  ;;  %v249_v19 = vunpack.c.l.bf16 %v1019_v62 }
  0x40   :  { %v1116_v16 = vpack.c.bf16 %v782_v63, %v781_v59  ;;  %v901_v17 = vmul.f32 %v782_v63, %v782_v63  ;;  %v158_v18 = vadd.f32 %v142_v0, %v89_v55  ;;  %v159_v3 = vadd.f32 %v143_v9, %v90_v60  ;;  %v31_v60 = vld [vmem:[%s1920_s0 + $0x40] ss:$8 sps:$4 sm:$0xff]  }
  0x41   :  { %v250_v20 = vunpack.c.l.bf16 %v1020_v5  ;;  %v251_v21 = vunpack.c.h.bf16 %v1019_v62  ;;  %v252_v22 = vunpack.c.l.bf16 %v1022_v7  ;;  %v279_v27 = vmul.f32 %v1394_v44, %v249_v19 }
  0x42   :  { %1144 = vst [vmem:[%s1922_s2 + $0x10] sm:$0xff] %v1116_v16   ;;  %1262 = vmatpush3.bf16.msra.mxu0 %v1116_v16  ;;  %v1285_v23 = vpack.c.bf16 %v901_v17, %v900_v8  ;;  %v328_v29 = vunpack.c.l.bf16 %v1045_v15  ;;  %v329_v30 = vunpack.c.h.bf16 %v1045_v15  ;;  %v390_v32 = vmul.f32 %v1411_v56, %v249_v19  ;;  %v34_v15 = vld [vmem:[%s1920_s0 + $0x4c] sm:$0x1]  ;;  %v999_v17 = vld [vmem:[%s1920_s0 + $0xc0] ss:$8 sps:$4 sm:$0xff]  }
  0x43   :  { %1263 = vmatprep.subr.bf16.mxu0 %v1306_v1  ;;  %v280_v31 = vmul.f32 %v1394_v44, %v251_v21  ;;  %v391_v33 = vmul.f32 %v1411_v56, %v250_v20  ;;  %v392_v34 = vmul.f32 %v1411_v56, %v251_v21  ;;  %v295_v37 = vadd.f32 %v279_v27, %v158_v18 }
  0x44   :  { %1286 = vmatpush3.bf16.msra.mxu1 %v1285_v23  ;;  %v348_v38 = vmul.f32 %v1397_v45, %v328_v29  ;;  %v349_v39 = vmul.f32 %v1397_v45, %v329_v30  ;;  %v393_v40 = vmul.f32 %v1411_v56, %v252_v22  ;;  %v422_v42 = vadd.f32 %v390_v32, %v184_v2  ;;  %v32_v2 = vld [vmem:[%s1920_s0 + $0x44] sm:$0x1] }
  0x45   :  { %v296_v41 = vadd.f32 %v280_v31, %v159_v3  ;;  %v423_v43 = vadd.f32 %v391_v33, %v185_v4  ;;  %v424_v46 = vadd.f32 %v392_v34, %v186_v12  ;;  %1287 = vmatprep.subr.bf16.mxu1 %v1306_v1  ;;  %v487_v51 = vunpack.c.l.bf16 %v1067_v35 }
  0x46   :  { %v364_v47 = vadd.f32 %v348_v38, %v295_v37  ;;  %v425_v48 = vadd.f32 %v393_v40, %v187_v13  ;;  %v488_v52 = vunpack.c.l.bf16 %v1068_v36  ;;  %v489_v53 = vunpack.c.h.bf16 %v1067_v35  ;;  %v1023_v37 = vld [vmem:[%s1920_s0 + $0x140] ss:$8 sps:$4 sm:$0xff]  }
  0x47   :  { %v365_v49 = vadd.f32 %v349_v39, %v296_v41  ;;  %v490_v54 = vunpack.c.l.bf16 %v1070_v6  ;;  %v566_v50 = vunpack.c.l.bf16 %v1093_v14  ;;  %v517_v55 = vmul.f32 %v1423_v10, %v487_v51  ;;  %v1026_v41 = vld [vmem:[%s1920_s0 + $0x14c] sm:$0x1] }
  0x48   :  { %v567_v57 = vunpack.c.h.bf16 %v1093_v14  ;;  %v628_v58 = vmul.f32 %v1446_v26, %v487_v51  ;;  %v629_v59 = vmul.f32 %v1446_v26, %v488_v52  ;;  %v518_v61 = vmul.f32 %v1423_v10, %v489_v53  ;;  %v1024_v14 = vld [vmem:[%s1920_s0 + $0x144] sm:$0x1] }
  0x49   :  { %v586_v62 = vmul.f32 %v1426_v11, %v566_v50  ;;  %v630_v63 = vmul.f32 %v1446_v26, %v489_v53  ;;  %v631_v0 = vmul.f32 %v1446_v26, %v490_v54  ;;  %v533_v4 = vadd.f32 %v517_v55, %v364_v47 }
  0x4a   :  { %v587_v5 = vmul.f32 %v1426_v11, %v567_v57  ;;  %v660_v7 = vadd.f32 %v628_v58, %v422_v42  ;;  %v661_v8 = vadd.f32 %v629_v59, %v423_v43  ;;  %v534_v9 = vadd.f32 %v518_v61, %v365_v49 }
  0x4b   :  { %v662_v12 = vadd.f32 %v630_v63, %v424_v46  ;;  %v663_v13 = vadd.f32 %v631_v0, %v425_v48  ;;  %v63_v16 = vunpack.c.l.bf16 %v31_v60  ;;  %v602_v18 = vadd.f32 %v586_v62, %v533_v4  ;;  %v1047_v48 = vld [vmem:[%s1920_s0 + $0x1c0] ss:$8 sps:$4 sm:$0xff]  }
  0x4c   :  { %v731_v19 = vrot.slane %v660_v7, 1  ;;  %v732_v3 = vrot.slane %v661_v8, 1  ;;  %v64_v20 = vunpack.c.l.bf16 %v32_v2  ;;  %v603_v21 = vadd.f32 %v587_v5, %v534_v9  ;;  %v1071_v4 = vld [vmem:[%s1920_s0 + $0x240] ss:$8 sps:$4 sm:$0xff]   ;;  %v1072_v5 = vld [vmem:[%s1920_s0 + $0x244] sm:$0x1] }
  0x4d   :  { %v734_v22 = vrot.slane %v662_v12, 1  ;;  %v735_v23 = vrot.slane %v663_v13, 1  ;;  %v65_v27 = vunpack.c.h.bf16 %v31_v60  ;;  %v66_v30 = vunpack.c.l.bf16 %v34_v15  ;;  %v1074_v13 = vld [vmem:[%s1920_s0 + $0x24c] sm:$0x1]  ;;  %v1095_v15 = vld [vmem:[%s1920_s0 + $0x2c0] ss:$8 sps:$4 sm:$0xff]  }
  0x4e   :  { %v733_v29 = vsel %vm712_vm0, %v731_v19, %v732_v3  ;;  %v91_v31 = vmul.f32 %v1369_v24, %v63_v16  ;;  %v124_v32 = vunpack.c.l.bf16 %v999_v17  ;;  %v125_v36 = vunpack.c.h.bf16 %v999_v17 }
  0x4f   :  { %v736_v33 = vsel %vm712_vm0, %v734_v22, %v735_v23  ;;  %v783_v34 = vadd.f32 %v733_v29, %v602_v18  ;;  %v92_v35 = vmul.f32 %v1369_v24, %v65_v27  ;;  %v188_v40 = vmul.f32 %v1376_v28, %v63_v16 }
  0x50   :  { %v784_v38 = vadd.f32 %v736_v33, %v603_v21  ;;  %v144_v39 = vmul.f32 %v1372_v25, %v124_v32  ;;  %v189_v6 = vmul.f32 %v1376_v28, %v64_v20  ;;  %v145_v43 = vmul.f32 %v1372_v25, %v125_v36 }
  0x51   :  { %v902_v42 = vmul.f32 %v783_v34, %v783_v34  ;;  %v190_v46 = vmul.f32 %v1376_v28, %v65_v27  ;;  %v191_v47 = vmul.f32 %v1376_v28, %v66_v30  ;;  %v253_v53 = vunpack.c.l.bf16 %v1023_v37 }
  0x52   :  { %v1121_v51 = vpack.c.bf16 %v784_v38, %v783_v34  ;;  %v903_v52 = vmul.f32 %v784_v38, %v784_v38  ;;  %v160_v49 = vadd.f32 %v144_v39, %v91_v31  ;;  %v161_v54 = vadd.f32 %v145_v43, %v92_v35  ;;  %v35_v35 = vld [vmem:[%s1920_s0 + $0x50] ss:$8 sps:$4 sm:$0xff]  }
  0x53   :  { %v254_v50 = vunpack.c.l.bf16 %v1024_v14  ;;  %v255_v55 = vunpack.c.h.bf16 %v1023_v37  ;;  %v256_v57 = vunpack.c.l.bf16 %v1026_v41  ;;  %v281_v59 = vmul.f32 %v1394_v44, %v253_v53 }
  0x54   :  { %1145 = vst [vmem:[%s1922_s2 + $0x18] sm:$0xff] %v1121_v51   ;;  %1265 = vmatpush3.bf16.msra.mxu0 %v1121_v51  ;;  %v1288_v58 = vpack.c.bf16 %v903_v52, %v902_v42  ;;  %v330_v60 = vunpack.c.l.bf16 %v1047_v48  ;;  %v331_v61 = vunpack.c.h.bf16 %v1047_v48  ;;  %v394_v63 = vmul.f32 %v1411_v56, %v253_v53  ;;  %v38_v48 = vld [vmem:[%s1920_s0 + $0x5c] sm:$0x1]  ;;  %v1001_v52 = vld [vmem:[%s1920_s0 + $0xd0] ss:$8 sps:$4 sm:$0xff]  }
  0x55   :  { %1266 = vmatprep.subr.bf16.mxu0 %v1306_v1  ;;  %v282_v62 = vmul.f32 %v1394_v44, %v255_v55  ;;  %v395_v0 = vmul.f32 %v1411_v56, %v254_v50  ;;  %v396_v2 = vmul.f32 %v1411_v56, %v255_v55  ;;  %v297_v7 = vadd.f32 %v281_v59, %v160_v49 }
  0x56   :  { %1289 = vmatpush3.bf16.msra.mxu1 %v1288_v58  ;;  %v350_v8 = vmul.f32 %v1397_v45, %v330_v60  ;;  %v351_v9 = vmul.f32 %v1397_v45, %v331_v61  ;;  %v397_v12 = vmul.f32 %v1411_v56, %v256_v57  ;;  %v426_v17 = vadd.f32 %v394_v63, %v188_v40  ;;  %v36_v40 = vld [vmem:[%s1920_s0 + $0x54] sm:$0x1] }
  0x57   :  { %v298_v16 = vadd.f32 %v282_v62, %v161_v54  ;;  %v427_v18 = vadd.f32 %v395_v0, %v189_v6  ;;  %v428_v19 = vadd.f32 %v396_v2, %v190_v46  ;;  %1290 = vmatprep.subr.bf16.mxu1 %v1306_v1  ;;  %v491_v21 = vunpack.c.l.bf16 %v1071_v4 }
  0x58   :  { %v366_v3 = vadd.f32 %v350_v8, %v297_v7  ;;  %v429_v20 = vadd.f32 %v397_v12, %v191_v47  ;;  %v492_v22 = vunpack.c.l.bf16 %v1072_v5  ;;  %v493_v27 = vunpack.c.h.bf16 %v1071_v4  ;;  %v1027_v7 = vld [vmem:[%s1920_s0 + $0x150] ss:$8 sps:$4 sm:$0xff]  }
  0x59   :  { %v367_v23 = vadd.f32 %v351_v9, %v298_v16  ;;  %v494_v29 = vunpack.c.l.bf16 %v1074_v13  ;;  %v568_v30 = vunpack.c.l.bf16 %v1095_v15  ;;  %v519_v31 = vmul.f32 %v1423_v10, %v491_v21  ;;  %v1030_v16 = vld [vmem:[%s1920_s0 + $0x15c] sm:$0x1] }
  0x5a   :  { %v569_v32 = vunpack.c.h.bf16 %v1095_v15  ;;  %v632_v33 = vmul.f32 %v1446_v26, %v491_v21  ;;  %v633_v34 = vmul.f32 %v1446_v26, %v492_v22  ;;  %v520_v36 = vmul.f32 %v1423_v10, %v493_v27  ;;  %v1028_v15 = vld [vmem:[%s1920_s0 + $0x154] sm:$0x1] }
  0x5b   :  { %v588_v37 = vmul.f32 %v1426_v11, %v568_v30  ;;  %v634_v38 = vmul.f32 %v1446_v26, %v493_v27  ;;  %v635_v39 = vmul.f32 %v1446_v26, %v494_v29  ;;  %v535_v6 = vadd.f32 %v519_v31, %v366_v3 }
  0x5c   :  { %v589_v14 = vmul.f32 %v1426_v11, %v569_v32  ;;  %v664_v41 = vadd.f32 %v632_v33, %v426_v17  ;;  %v665_v42 = vadd.f32 %v633_v34, %v427_v18  ;;  %v536_v43 = vadd.f32 %v520_v36, %v367_v23 }
  0x5d   :  { %v666_v46 = vadd.f32 %v634_v38, %v428_v19  ;;  %v667_v47 = vadd.f32 %v635_v39, %v429_v20  ;;  %v67_v51 = vunpack.c.l.bf16 %v35_v35  ;;  %v604_v49 = vadd.f32 %v588_v37, %v535_v6  ;;  %v1049_v20 = vld [vmem:[%s1920_s0 + $0x1d0] ss:$8 sps:$4 sm:$0xff]  }
  0x5e   :  { %v737_v53 = vrot.slane %v664_v41, 1  ;;  %v738_v54 = vrot.slane %v665_v42, 1  ;;  %v68_v50 = vunpack.c.l.bf16 %v36_v40  ;;  %v605_v55 = vadd.f32 %v589_v14, %v536_v43  ;;  %v1075_v6 = vld [vmem:[%s1920_s0 + $0x250] ss:$8 sps:$4 sm:$0xff]   ;;  %v1076_v14 = vld [vmem:[%s1920_s0 + $0x254] sm:$0x1] }
  0x5f   :  { %v740_v57 = vrot.slane %v666_v46, 1  ;;  %v741_v58 = vrot.slane %v667_v47, 1  ;;  %v69_v59 = vunpack.c.h.bf16 %v35_v35  ;;  %v70_v61 = vunpack.c.l.bf16 %v38_v48  ;;  %v1078_v47 = vld [vmem:[%s1920_s0 + $0x25c] sm:$0x1]  ;;  %v1097_v48 = vld [vmem:[%s1920_s0 + $0x2d0] ss:$8 sps:$4 sm:$0xff]  }
  0x60   :  { %v739_v60 = vsel %vm712_vm0, %v737_v53, %v738_v54  ;;  %v93_v62 = vmul.f32 %v1369_v24, %v67_v51  ;;  %v126_v63 = vunpack.c.l.bf16 %v1001_v52  ;;  %v127_v5 = vunpack.c.h.bf16 %v1001_v52 }
  0x61   :  { %v742_v0 = vsel %vm712_vm0, %v740_v57, %v741_v58  ;;  %v785_v2 = vadd.f32 %v739_v60, %v604_v49  ;;  %v94_v4 = vmul.f32 %v1369_v24, %v69_v59  ;;  %v192_v12 = vmul.f32 %v1376_v28, %v67_v51 }
  0x62   :  { %v786_v8 = vadd.f32 %v742_v0, %v605_v55  ;;  %v146_v9 = vmul.f32 %v1372_v25, %v126_v63  ;;  %v193_v13 = vmul.f32 %v1376_v28, %v68_v50  ;;  %v147_v18 = vmul.f32 %v1372_v25, %v127_v5 }
  0x63   :  { %v904_v17 = vmul.f32 %v785_v2, %v785_v2  ;;  %v194_v19 = vmul.f32 %v1376_v28, %v69_v59  ;;  %v195_v3 = vmul.f32 %v1376_v28, %v70_v61  ;;  %v257_v27 = vunpack.c.l.bf16 %v1027_v7 }
  0x64   :  { %v1126_v21 = vpack.c.bf16 %v786_v8, %v785_v2  ;;  %v905_v22 = vmul.f32 %v786_v8, %v786_v8  ;;  %v162_v23 = vadd.f32 %v146_v9, %v93_v62  ;;  %v163_v29 = vadd.f32 %v147_v18, %v94_v4  ;;  %v39_v4 = vld [vmem:[%s1920_s0 + $0x60] ss:$8 sps:$4 sm:$0xff]  }
  0x65   :  { %v258_v30 = vunpack.c.l.bf16 %v1028_v15  ;;  %v259_v31 = vunpack.c.h.bf16 %v1027_v7  ;;  %v260_v32 = vunpack.c.l.bf16 %v1030_v16  ;;  %v283_v34 = vmul.f32 %v1394_v44, %v257_v27 }
  0x66   :  { %1146 = vst [vmem:[%s1922_s2 + $0x20] sm:$0xff] %v1126_v21   ;;  %1268 = vmatpush3.bf16.msra.mxu0 %v1126_v21  ;;  %v1291_v33 = vpack.c.bf16 %v905_v22, %v904_v17  ;;  %v332_v35 = vunpack.c.l.bf16 %v1049_v20  ;;  %v333_v36 = vunpack.c.h.bf16 %v1049_v20  ;;  %v398_v38 = vmul.f32 %v1411_v56, %v257_v27  ;;  %v42_v20 = vld [vmem:[%s1920_s0 + $0x6c] sm:$0x1]  ;;  %v1003_v22 = vld [vmem:[%s1920_s0 + $0xe0] ss:$8 sps:$4 sm:$0xff]  }
  0x67   :  { %1269 = vmatprep.subr.bf16.mxu0 %v1306_v1  ;;  %v284_v37 = vmul.f32 %v1394_v44, %v259_v31  ;;  %v399_v39 = vmul.f32 %v1411_v56, %v258_v30  ;;  %v400_v40 = vmul.f32 %v1411_v56, %v259_v31  ;;  %v299_v41 = vadd.f32 %v283_v34, %v162_v23 }
  0x68   :  { %1292 = vmatpush3.bf16.msra.mxu1 %v1291_v33  ;;  %v352_v42 = vmul.f32 %v1397_v45, %v332_v35  ;;  %v353_v43 = vmul.f32 %v1397_v45, %v333_v36  ;;  %v401_v46 = vmul.f32 %v1411_v56, %v260_v32  ;;  %v430_v52 = vadd.f32 %v398_v38, %v192_v12  ;;  %v40_v12 = vld [vmem:[%s1920_s0 + $0x64] sm:$0x1] }
  0x69   :  { %v300_v51 = vadd.f32 %v284_v37, %v163_v29  ;;  %v431_v49 = vadd.f32 %v399_v39, %v193_v13  ;;  %v432_v53 = vadd.f32 %v400_v40, %v194_v19  ;;  %1293 = vmatprep.subr.bf16.mxu1 %v1306_v1  ;;  %v495_v55 = vunpack.c.l.bf16 %v1075_v6 }
  0x6a   :  { %v368_v54 = vadd.f32 %v352_v42, %v299_v41  ;;  %v433_v50 = vadd.f32 %v401_v46, %v195_v3  ;;  %v496_v57 = vunpack.c.l.bf16 %v1076_v14  ;;  %v497_v59 = vunpack.c.h.bf16 %v1075_v6  ;;  %v1031_v41 = vld [vmem:[%s1920_s0 + $0x160] ss:$8 sps:$4 sm:$0xff]  }
  0x6b   :  { %v369_v58 = vadd.f32 %v353_v43, %v300_v51  ;;  %v498_v60 = vunpack.c.l.bf16 %v1078_v47  ;;  %v570_v61 = vunpack.c.l.bf16 %v1097_v48  ;;  %v521_v62 = vmul.f32 %v1423_v10, %v495_v55  ;;  %v1034_v51 = vld [vmem:[%s1920_s0 + $0x16c] sm:$0x1] }
  0x6c   :  { %v571_v63 = vunpack.c.h.bf16 %v1097_v48  ;;  %v636_v0 = vmul.f32 %v1446_v26, %v495_v55  ;;  %v637_v2 = vmul.f32 %v1446_v26, %v496_v57  ;;  %v522_v5 = vmul.f32 %v1423_v10, %v497_v59  ;;  %v1032_v48 = vld [vmem:[%s1920_s0 + $0x164] sm:$0x1] }
  0x6d   :  { %v590_v7 = vmul.f32 %v1426_v11, %v570_v61  ;;  %v638_v8 = vmul.f32 %v1446_v26, %v497_v59  ;;  %v639_v9 = vmul.f32 %v1446_v26, %v498_v60  ;;  %v537_v13 = vadd.f32 %v521_v62, %v368_v54 }
  0x6e   :  { %v591_v15 = vmul.f32 %v1426_v11, %v571_v63  ;;  %v668_v16 = vadd.f32 %v636_v0, %v430_v52  ;;  %v669_v17 = vadd.f32 %v637_v2, %v431_v49  ;;  %v538_v18 = vadd.f32 %v522_v5, %v369_v58 }
  0x6f   :  { %v670_v19 = vadd.f32 %v638_v8, %v432_v53  ;;  %v671_v3 = vadd.f32 %v639_v9, %v433_v50  ;;  %v71_v21 = vunpack.c.l.bf16 %v39_v4  ;;  %v606_v23 = vadd.f32 %v590_v7, %v537_v13  ;;  %v1051_v50 = vld [vmem:[%s1920_s0 + $0x1e0] ss:$8 sps:$4 sm:$0xff]  }
  0x70   :  { %v743_v27 = vrot.slane %v668_v16, 1  ;;  %v744_v29 = vrot.slane %v669_v17, 1  ;;  %v72_v30 = vunpack.c.l.bf16 %v40_v12  ;;  %v607_v31 = vadd.f32 %v591_v15, %v538_v18  ;;  %v1079_v13 = vld [vmem:[%s1920_s0 + $0x260] ss:$8 sps:$4 sm:$0xff]   ;;  %v1080_v15 = vld [vmem:[%s1920_s0 + $0x264] sm:$0x1] }
  0x71   :  { %v746_v32 = vrot.slane %v670_v19, 1  ;;  %v747_v33 = vrot.slane %v671_v3, 1  ;;  %v73_v34 = vunpack.c.h.bf16 %v39_v4  ;;  %v74_v36 = vunpack.c.l.bf16 %v42_v20  ;;  %v1082_v3 = vld [vmem:[%s1920_s0 + $0x26c] sm:$0x1]  ;;  %v1099_v20 = vld [vmem:[%s1920_s0 + $0x2e0] ss:$8 sps:$4 sm:$0xff]  }
  0x72   :  { %v745_v35 = vsel %vm712_vm0, %v743_v27, %v744_v29  ;;  %v95_v37 = vmul.f32 %v1369_v24, %v71_v21  ;;  %v128_v38 = vunpack.c.l.bf16 %v1003_v22  ;;  %v129_v14 = vunpack.c.h.bf16 %v1003_v22 }
  0x73   :  { %v748_v39 = vsel %vm712_vm0, %v746_v32, %v747_v33  ;;  %v787_v40 = vadd.f32 %v745_v35, %v606_v23  ;;  %v96_v6 = vmul.f32 %v1369_v24, %v73_v34  ;;  %v196_v46 = vmul.f32 %v1376_v28, %v71_v21 }
  0x74   :  { %v788_v42 = vadd.f32 %v748_v39, %v607_v31  ;;  %v148_v43 = vmul.f32 %v1372_v25, %v128_v38  ;;  %v197_v47 = vmul.f32 %v1376_v28, %v72_v30  ;;  %v149_v49 = vmul.f32 %v1372_v25, %v129_v14 }
  0x75   :  { %v906_v52 = vmul.f32 %v787_v40, %v787_v40  ;;  %v198_v53 = vmul.f32 %v1376_v28, %v73_v34  ;;  %v199_v54 = vmul.f32 %v1376_v28, %v74_v36  ;;  %v261_v59 = vunpack.c.l.bf16 %v1031_v41 }
  0x76   :  { %v1131_v55 = vpack.c.bf16 %v788_v42, %v787_v40  ;;  %v907_v57 = vmul.f32 %v788_v42, %v788_v42  ;;  %v164_v58 = vadd.f32 %v148_v43, %v95_v37  ;;  %v165_v60 = vadd.f32 %v149_v49, %v96_v6  ;;  %v43_v6 = vld [vmem:[%s1920_s0 + $0x70] ss:$8 sps:$4 sm:$0xff]  }
  0x77   :  { %v262_v61 = vunpack.c.l.bf16 %v1032_v48  ;;  %v263_v62 = vunpack.c.h.bf16 %v1031_v41  ;;  %v264_v63 = vunpack.c.l.bf16 %v1034_v51  ;;  %v285_v2 = vmul.f32 %v1394_v44, %v261_v59 }
  0x78   :  { %1147 = vst [vmem:[%s1922_s2 + $0x28] sm:$0xff] %v1131_v55   ;;  %1271 = vmatpush3.bf16.msra.mxu0 %v1131_v55  ;;  %v1294_v0 = vpack.c.bf16 %v907_v57, %v906_v52  ;;  %v334_v4 = vunpack.c.l.bf16 %v1051_v50  ;;  %v335_v5 = vunpack.c.h.bf16 %v1051_v50  ;;  %v402_v8 = vmul.f32 %v1411_v56, %v261_v59  ;;  %v46_v50 = vld [vmem:[%s1920_s0 + $0x7c] sm:$0x1]  ;;  %v1005_v57 = vld [vmem:[%s1920_s0 + $0xf0] ss:$8 sps:$4 sm:$0xff]  }
  0x79   :  { %1272 = vmatprep.subr.bf16.mxu0 %v1306_v1  ;;  %v286_v7 = vmul.f32 %v1394_v44, %v263_v62  ;;  %v403_v9 = vmul.f32 %v1411_v56, %v262_v61  ;;  %v404_v12 = vmul.f32 %v1411_v56, %v263_v62  ;;  %v301_v16 = vadd.f32 %v285_v2, %v164_v58 }
  0x7a   :  { %1295 = vmatpush3.bf16.msra.mxu1 %v1294_v0  ;;  %v354_v17 = vmul.f32 %v1397_v45, %v334_v4  ;;  %v355_v18 = vmul.f32 %v1397_v45, %v335_v5  ;;  %v405_v19 = vmul.f32 %v1411_v56, %v264_v63  ;;  %v434_v22 = vadd.f32 %v402_v8, %v196_v46  ;;  %v44_v46 = vld [vmem:[%s1920_s0 + $0x74] sm:$0x1] }
  0x7b   :  { %v302_v21 = vadd.f32 %v286_v7, %v165_v60  ;;  %v435_v23 = vadd.f32 %v403_v9, %v197_v47  ;;  %v436_v27 = vadd.f32 %v404_v12, %v198_v53  ;;  %1296 = vmatprep.subr.bf16.mxu1 %v1306_v1  ;;  %v499_v31 = vunpack.c.l.bf16 %v1079_v13 }
  0x7c   :  { %v370_v29 = vadd.f32 %v354_v17, %v301_v16  ;;  %v437_v30 = vadd.f32 %v405_v19, %v199_v54  ;;  %v500_v32 = vunpack.c.l.bf16 %v1080_v15  ;;  %v501_v34 = vunpack.c.h.bf16 %v1079_v13  ;;  %v1035_v16 = vld [vmem:[%s1920_s0 + $0x170] ss:$8 sps:$4 sm:$0xff]  }
  0x7d   :  { %v371_v33 = vadd.f32 %v355_v18, %v302_v21  ;;  %v502_v35 = vunpack.c.l.bf16 %v1082_v3  ;;  %v572_v36 = vunpack.c.l.bf16 %v1099_v20  ;;  %v523_v37 = vmul.f32 %v1423_v10, %v499_v31 }
  0x7e   :  { %v573_v38 = vunpack.c.h.bf16 %v1099_v20  ;;  %v640_v39 = vmul.f32 %v1446_v26, %v499_v31  ;;  %v641_v40 = vmul.f32 %v1446_v26, %v500_v32  ;;  %v524_v14 = vmul.f32 %v1423_v10, %v501_v34  ;;  %v1036_v20 = vld [vmem:[%s1920_s0 + $0x174] sm:$0x1] }
  0x7f   :  { %v592_v41 = vmul.f32 %v1426_v11, %v572_v36  ;;  %v642_v42 = vmul.f32 %v1446_v26, %v501_v34  ;;  %v643_v43 = vmul.f32 %v1446_v26, %v502_v35  ;;  %v539_v47 = vadd.f32 %v523_v37, %v370_v29  ;;  %v1053_v29 = vld [vmem:[%s1920_s0 + $0x1f0] ss:$8 sps:$4 sm:$0xff]  }
  0x80   :  { %v593_v48 = vmul.f32 %v1426_v11, %v573_v38  ;;  %v672_v51 = vadd.f32 %v640_v39, %v434_v22  ;;  %v673_v52 = vadd.f32 %v641_v40, %v435_v23  ;;  %v540_v49 = vadd.f32 %v524_v14, %v371_v33 }
  0x81   :  { %v674_v53 = vadd.f32 %v642_v42, %v436_v27  ;;  %v675_v54 = vadd.f32 %v643_v43, %v437_v30  ;;  %v75_v55 = vunpack.c.l.bf16 %v43_v6  ;;  %v608_v58 = vadd.f32 %v592_v41, %v539_v47  ;;  %v1083_v42 = vld [vmem:[%s1920_s0 + $0x270] ss:$8 sps:$4 sm:$0xff]   ;;  %v1084_v43 = vld [vmem:[%s1920_s0 + $0x274] sm:$0x1] }
  0x82   :  { %v749_v59 = vrot.slane %v672_v51, 1  ;;  %v750_v60 = vrot.slane %v673_v52, 1  ;;  %v76_v61 = vunpack.c.l.bf16 %v44_v46  ;;  %v609_v62 = vadd.f32 %v593_v48, %v540_v49  ;;  %v1086_v51 = vld [vmem:[%s1920_s0 + $0x27c] sm:$0x1]  ;;  %v1101_v52 = vld [vmem:[%s1920_s0 + $0x2f0] ss:$8 sps:$4 sm:$0xff]  }
  0x83   :  { %v752_v63 = vrot.slane %v674_v53, 1  ;;  %v753_v0 = vrot.slane %v675_v54, 1  ;;  %v77_v2 = vunpack.c.h.bf16 %v43_v6  ;;  %v78_v5 = vunpack.c.l.bf16 %v46_v50 }
  0x84   :  { %v751_v4 = vsel %vm712_vm0, %v749_v59, %v750_v60  ;;  %v97_v7 = vmul.f32 %v1369_v24, %v75_v55  ;;  %v130_v8 = vunpack.c.l.bf16 %v1005_v57  ;;  %v131_v15 = vunpack.c.h.bf16 %v1005_v57 }
  0x85   :  { %v754_v9 = vsel %vm712_vm0, %v752_v63, %v753_v0  ;;  %v789_v12 = vadd.f32 %v751_v4, %v608_v58  ;;  %v98_v13 = vmul.f32 %v1369_v24, %v77_v2  ;;  %v200_v19 = vmul.f32 %v1376_v28, %v75_v55  ;;  %v1038_v24 = vld [vmem:[%s1920_s0 + $0x17c] sm:$0x1] }
  0x86   :  { %v790_v17 = vadd.f32 %v754_v9, %v609_v62  ;;  %v150_v18 = vmul.f32 %v1372_v25, %v130_v8  ;;  %v201_v3 = vmul.f32 %v1376_v28, %v76_v61  ;;  %v151_v22 = vmul.f32 %v1372_v25, %v131_v15 }
  0x87   :  { %v908_v21 = vmul.f32 %v789_v12, %v789_v12  ;;  %v202_v23 = vmul.f32 %v1376_v28, %v77_v2  ;;  %v203_v27 = vmul.f32 %v1376_v28, %v78_v5  ;;  %v265_v33 = vunpack.c.l.bf16 %v1035_v16 }
  0x88   :  { %v1136_v30 = vpack.c.bf16 %v790_v17, %v789_v12  ;;  %v909_v31 = vmul.f32 %v790_v17, %v790_v17  ;;  %v166_v32 = vadd.f32 %v150_v18, %v97_v7  ;;  %v167_v34 = vadd.f32 %v151_v22, %v98_v13 }
  0x89   :  { %v266_v35 = vunpack.c.l.bf16 %v1036_v20  ;;  %v267_v36 = vunpack.c.h.bf16 %v1035_v16  ;;  %v268_v37 = vunpack.c.l.bf16 %v1038_v24  ;;  %v287_v28 = vmul.f32 %v1394_v44, %v265_v33 }
  0x8a   :  { %1148 = vst [vmem:[%s1922_s2 + $0x30] sm:$0xff] %v1136_v30   ;;  %1274 = vmatpush3.bf16.msra.mxu0 %v1136_v30  ;;  %v1297_v25 = vpack.c.bf16 %v909_v31, %v908_v21  ;;  %v336_v38 = vunpack.c.l.bf16 %v1053_v29  ;;  %v337_v39 = vunpack.c.h.bf16 %v1053_v29  ;;  %v406_v6 = vmul.f32 %v1411_v56, %v265_v33 }
  0x8b   :  { %1275 = vmatprep.subr.bf16.mxu0 %v1306_v1  ;;  %v288_v40 = vmul.f32 %v1394_v44, %v267_v36  ;;  %v407_v14 = vmul.f32 %v1411_v56, %v266_v35  ;;  %v408_v41 = vmul.f32 %v1411_v56, %v267_v36  ;;  %v303_v46 = vadd.f32 %v287_v28, %v166_v32 }
  0x8c   :  { %1298 = vmatpush3.bf16.msra.mxu1 %v1297_v25  ;;  %v356_v47 = vmul.f32 %v1397_v45, %v336_v38  ;;  %v357_v44 = vmul.f32 %v1397_v45, %v337_v39  ;;  %v409_v48 = vmul.f32 %v1411_v56, %v268_v37  ;;  %v438_v53 = vadd.f32 %v406_v6, %v200_v19 }
  0x8d   :  { %v304_v49 = vadd.f32 %v288_v40, %v167_v34  ;;  %v439_v54 = vadd.f32 %v407_v14, %v201_v3  ;;  %v440_v50 = vadd.f32 %v408_v41, %v202_v23  ;;  %1299 = vmatprep.subr.bf16.mxu1 %v1306_v1  ;;  %v503_v58 = vunpack.c.l.bf16 %v1083_v42 }
  0x8e   :  { %v372_v55 = vadd.f32 %v356_v47, %v303_v46  ;;  %v441_v57 = vadd.f32 %v409_v48, %v203_v27  ;;  %v504_v45 = vunpack.c.l.bf16 %v1084_v43  ;;  %v505_v56 = vunpack.c.h.bf16 %v1083_v42 }
  0x8f   :  { %v373_v59 = vadd.f32 %v357_v44, %v304_v49  ;;  %v506_v60 = vunpack.c.l.bf16 %v1086_v51  ;;  %v574_v61 = vunpack.c.l.bf16 %v1101_v52  ;;  %v525_v62 = vmul.f32 %v1423_v10, %v503_v58 }
  0x90   :  { %v575_v63 = vunpack.c.h.bf16 %v1101_v52  ;;  %v644_v0 = vmul.f32 %v1446_v26, %v503_v58  ;;  %v645_v2 = vmul.f32 %v1446_v26, %v504_v45  ;;  %v526_v4 = vmul.f32 %v1423_v10, %v505_v56 }
  0x91   :  { %v594_v5 = vmul.f32 %v1426_v11, %v574_v61  ;;  %v646_v1 = vmul.f32 %v1446_v26, %v505_v56  ;;  %v647_v7 = vmul.f32 %v1446_v26, %v506_v60  ;;  %v541_v8 = vadd.f32 %v525_v62, %v372_v55 }
  0x92   :  { %v595_v9 = vmul.f32 %v1426_v11, %v575_v63  ;;  %v676_v12 = vadd.f32 %v644_v0, %v438_v53  ;;  %v677_v13 = vadd.f32 %v645_v2, %v439_v54  ;;  %v542_v15 = vadd.f32 %v526_v4, %v373_v59 }
  0x93   :  { %v678_v16 = vadd.f32 %v646_v1, %v440_v50  ;;  %v679_v17 = vadd.f32 %v647_v7, %v441_v57  ;;  %v610_v18 = vadd.f32 %v594_v5, %v541_v8  ;;  %v1308_v21 = vmov 0.0  }
  0x94   :  { %v755_v19 = vrot.slane %v676_v12, 1  ;;  %v756_v3 = vrot.slane %v677_v13, 1  ;;  %v611_v20 = vadd.f32 %v595_v9, %v542_v15  ;;  %1216 = vmatprep.mubr.msk.f32.mxu0 %vm1307_vm1, %v1308_v21  ;;  %1251 = vmatprep.mubr.msk.f32.mxu1 %vm1307_vm1, %v1308_v21  ;;  %v1309_v32 = vmov 1.0  }
  0x95   :  { %v758_v24 = vrot.slane %v678_v16, 1  ;;  %v759_v10 = vrot.slane %v679_v17, 1 }
  0x96   :  { %v757_v26 = vsel %vm712_vm0, %v755_v19, %v756_v3 }
  0x97   :  { %v760_v22 = vsel %vm712_vm0, %v758_v24, %v759_v10  ;;  %v791_v11 = vadd.f32 %v757_v26, %v610_v18 }
  0x98   :  { %v792_v23 = vadd.f32 %v760_v22, %v611_v20 }
  0x99   :  { %v910_v27 = vmul.f32 %v791_v11, %v791_v11 }
  0x9a   :  { %v1141_v29 = vpack.c.bf16 %v792_v23, %v791_v11  ;;  %v911_v30 = vmul.f32 %v792_v23, %v792_v23 }
  0x9c   :  { %1149 = vst [vmem:[%s1922_s2 + $0x38] sm:$0xff] %v1141_v29   ;;  %1277 = vmatpush3.bf16.msra.mxu0 %v1141_v29  ;;  %v1300_v31 = vpack.c.bf16 %v911_v30, %v910_v27 }
  0x9e   :  { %1301 = vmatpush3.bf16.msra.mxu1 %v1300_v31 }
  0x9f   :  { %1217 = vmatmul.mubr.f32.vlgmr.msra.gmra.mrb[0].mxu0 %v1309_v32 }
  0xa1   :  { %1252 = vmatmul.mubr.f32.vlgmr.msra.gmra.mrb[0].mxu1 %v1309_v32 }
 0x172   :  { %v891_v33 = vpop.f32.mrb[0].mxu0 }
 0x173   :  { %895 = vst [vmem:[%s1923_s3] sm:$0x1] %v891_v33  ;;  %v1218_v34 = vpop.f32.mrb[1].mxu0 }
 0x174   :  { %v978_v35 = vpop.f32.mrb[0].mxu1 }
 0x175   :  { %982 = vst [vmem:[%s1923_s3 + $0x1] sm:$0x1] %v978_v35  ;;  %v1253_v36 = vpop.f32.mrb[1].mxu1 }

</bundles_post_ra>
